<compile_context>
chip_gen: v5e
topology: v5e:2x2
jax: 0.10.0
libtpu: 0.0.40
codegen_flags: <defaults>
</compile_context>

<pallas_src>
import functools
import math

import jax
import jax.numpy as jnp
from jax.experimental import pallas as pl
from jax.experimental.pallas import tpu as pltpu


def _act(x):
    # activation_fn chosen deterministically for this synthetic module: ReLU
    return jnp.maximum(x, 0.0)


def _fused_kernel(diag_ref, tail_ref, kemb_ref,
                  w11, b11, w12, b12,          # Residual 1 (with end activation)
                  w21, b21, w22, b22,          # Residual 2 (no end activation)
                  w3,                          # final Linear(2d -> 1, bias=False)
                  out_ref,
                  tot_acc,                     # (8, lane) scratch
                  *, d, g, defer_sublane):
    c = pl.program_id(1)

    @pl.when(c == 0)
    def _():
        tot_acc[...] = jnp.zeros_like(tot_acc)

    blk = kemb_ref[...]                                        # (1, chunk, lane)
    chunk, lane = blk.shape[1], blk.shape[2]
    if defer_sublane:
        # Strictly vreg-wise VPU adds; cross-sublane reduce deferred to epilogue.
        tot_acc[...] += blk[0].reshape(chunk // 8, 8, lane).sum(axis=0)
    else:
        # Conservative (known-good) formulation: per-step sublane reduce.
        tot_acc[0:1, :] = tot_acc[0:1, :] + jnp.sum(blk[0], axis=0, keepdims=True)

    @pl.when(c == pl.num_programs(1) - 1)
    def _():
        col = jnp.sum(tot_acc[...], axis=0, keepdims=True)     # (1, lane)  XLU once
        total = col[:, 0:d]
        for gi in range(1, g):                                 # fold packed groups
            total = total + col[:, gi * d:(gi + 1) * d]        # (1, d)
        total = total + tail_ref[0]                            # wrapper remainder rows

        x1 = diag_ref[0]                                       # diagonal pool (1, d)
        x2 = total - x1                                        # off-diagonal pool
        feat = jnp.concatenate([x1, x2], axis=-1)              # (1, 2d)

        # Residual block 1 (end activation)
        h = _act(jnp.dot(feat, w11[...], preferred_element_type=jnp.float32) + b11[...])
        y = _act(feat + jnp.dot(h, w12[...], preferred_element_type=jnp.float32) + b12[...])

        # Residual block 2 (no end activation)
        h = _act(jnp.dot(y, w21[...], preferred_element_type=jnp.float32) + b21[...])
        z = y + jnp.dot(h, w22[...], preferred_element_type=jnp.float32) + b22[...]

        # final Linear(2d -> 1, bias=False)
        out_ref[0] = jnp.dot(z, w3[...],
                             preferred_element_type=jnp.float32).astype(out_ref.dtype)


def _round_up(x, m):
    return (x + m - 1) // m * m


def three_order_output_block(kemb, params):
    """kemb: (B, N, N, N, d) float32; returns (B, 1). pooling_level='middle'."""
    B, N, _, _, d = kemb.shape
    n3 = N * N * N
    two_d = 2 * d
    f32 = jnp.float32

    # Diagonal pool touches only B*N*d elements: tiny gather + sum in plain JAX.
    idx = jnp.arange(N)
    diag = jnp.sum(kemb[:, idx, idx, idx], axis=1).astype(f32)          # (B, d)

    # Generalized lane packing: smallest g with (g*d) % 128 == 0.
    g_full = math.lcm(d, 128) // d
    g = g_full if n3 % g_full == 0 else 1
    lane = g * d
    rows = n3 // g
    kflat = kemb.reshape(B, rows, lane)                                 # metadata reshape

    # Generation-aware VMEM / chunk sizing.
    try:
        vmem_cap = int(pltpu.get_tpu_info().vmem_capacity_bytes)
    except Exception:
        vmem_cap = 64 << 20                         # conservative (v7x per-TC)

    const_bytes = ((4 * two_d * two_d + 4 * two_d + two_d)   # weights (single-buffered)
                   + 2 * 2 * d) * 4                          # diag + tail (double-buffered)
    scratch_bytes = 8 * lane * 4
    headroom = 8 << 20
    avail = max(2 << 20, vmem_cap - headroom - const_bytes - scratch_bytes)
    per_buf_budget = max(1 << 20, min(avail // 2, 8 << 20))  # kemb double-buffered

    bytes_per_row = lane * 4
    cap = max(8, (per_buf_budget // bytes_per_row) // 8 * 8)
    chunk = min(cap, _round_up(rows, 8))
    n_chunks = max(1, rows // chunk)
    main_rows = n_chunks * chunk

    if main_rows > rows:
        # Only happens when the whole (small) tensor fits in one chunk: cheap pad.
        pad = jnp.zeros((B, main_rows - rows, lane), kflat.dtype)
        kflat = jnp.concatenate([kflat, pad], axis=1)
        tail = jnp.zeros((B, d), f32)
    elif main_rows < rows:
        # Remainder rows (< chunk) summed here; the grid never reads them.
        tail = jnp.sum(kflat[:, main_rows:, :].astype(f32).reshape(B, -1, d), axis=1)
    else:
        tail = jnp.zeros((B, d), f32)

    diag3 = diag.reshape(B, 1, d)
    tail3 = tail.reshape(B, 1, d)

    tile_bytes = chunk * lane * 4
    vmem_limit = int(min(vmem_cap,
                         max(2 * tile_bytes + const_bytes + scratch_bytes + (4 << 20),
                             32 << 20)))

    (w11, b11, w12, b12, w21, b21, w22, b22, w3) = params

    cost = pl.CostEstimate(
        flops=int(B * main_rows * lane + B * (8 * two_d * two_d + 10 * two_d)),
        transcendentals=0,
        bytes_accessed=int(B * rows * lane * 4 + const_bytes + B * 4))

    def _specs(single_buffer_weights):
        wkw = {}
        if single_buffer_weights and hasattr(pl, "Buffered"):
            wkw = dict(pipeline_mode=pl.Buffered(1))
        const2 = lambda b, c: (0, 0)
        wspec = lambda shape: pl.BlockSpec(shape, const2, **wkw)
        in_specs = [
            pl.BlockSpec((1, 1, d), lambda b, c: (b, 0, 0)),            # diag pool
            pl.BlockSpec((1, 1, d), lambda b, c: (b, 0, 0)),            # tail remainder
            pl.BlockSpec((1, chunk, lane), lambda b, c: (b, c, 0)),     # streamed kemb
            wspec((two_d, two_d)), wspec((1, two_d)),                   # w11, b11
            wspec((two_d, two_d)), wspec((1, two_d)),                   # w12, b12
            wspec((two_d, two_d)), wspec((1, two_d)),                   # w21, b21
            wspec((two_d, two_d)), wspec((1, two_d)),                   # w22, b22
            wspec((two_d, 1)),                                          # w3
        ]
        out_specs = pl.BlockSpec((1, 1, 1), lambda b, c: (b, 0, 0))
        return in_specs, out_specs

    def _run(optimized):
        in_specs, out_specs = _specs(single_buffer_weights=optimized)
        kernel = functools.partial(_fused_kernel, d=d, g=g, defer_sublane=optimized)
        return pl.pallas_call(
            kernel,
            out_shape=jax.ShapeDtypeStruct((B, 1, 1), f32),
            grid=(B, n_chunks),
            in_specs=in_specs,
            out_specs=out_specs,
            scratch_shapes=[pltpu.VMEM((8, lane), f32)],
            compiler_params=pltpu.CompilerParams(
                dimension_semantics=("parallel", "arbitrary"),
                vmem_limit_bytes=vmem_limit),
            cost_estimate=cost,
        )(diag3, tail3, kflat, w11, b11, w12, b12, w21, b21, w22, b22, w3)

    try:
        out = _run(True)
    except Exception:
        # Older jax without BlockSpec(pipeline_mode=...) or reshape lowering quirk:
        # retry with the conservative (known-good) formulation.
        out = _run(False)
    return out.reshape(B, 1)


def make_params(key, hidden_dim, pattern_num=2):
    """Deterministic synthetic weights, stored already transposed (in, out)."""
    D = pattern_num * hidden_dim
    ks = jax.random.split(key, 9)
    s = 1.0 / jnp.sqrt(jnp.float32(D))
    lin = lambda k, i, o: jax.random.uniform(k, (i, o), jnp.float32, -s, s)
    bias = lambda k, o: jax.random.uniform(k, (1, o), jnp.float32, -s, s)
    w11, b11 = lin(ks[0], D, D), bias(ks[1], D)
    w12, b12 = lin(ks[2], D, D), bias(ks[3], D)
    w21, b21 = lin(ks[4], D, D), bias(ks[5], D)
    w22, b22 = lin(ks[6], D, D), bias(ks[7], D)
    w3 = lin(ks[8], D, 1)
    return (w11, b11, w12, b12, w21, b21, w22, b22, w3)


def ref_forward(kemb, params):
    """Pure-JAX reference mirroring the PyTorch forward (pooling_level='middle')."""
    B, N = kemb.shape[0], kemb.shape[1]
    idx = jnp.arange(N)
    x1 = jnp.sum(kemb[:, idx, idx, idx], axis=1)
    x2 = jnp.sum(kemb, axis=(1, 2, 3)) - x1
    feat = jnp.concatenate([x1, x2], axis=-1)
    (w11, b11, w12, b12, w21, b21, w22, b22, w3) = params
    h = _act(feat @ w11 + b11)
    y = _act(feat + (h @ w12 + b12))
    h = _act(y @ w21 + b21)
    z = y + (h @ w22 + b22)
    return z @ w3


if __name__ == "__main__":
    B, N, d = 2, 8, 32          # hidden_dim=32, pooling_level='middle' -> pattern_num=2
    key = jax.random.PRNGKey(0)
    k_x, k_p = jax.random.split(key)
    kemb = jax.random.normal(k_x, (B, N, N, N, d), jnp.float32)
    params = make_params(k_p, hidden_dim=d, pattern_num=2)

    out = three_order_output_block(kemb, params)
    out = jax.block_until_ready(out)

    ref = ref_forward(kemb, params)
    assert out.shape == (B, 1)
    assert jnp.allclose(out, ref, atol=1e-3, rtol=1e-3), (out, ref)
    print("KERNEL_OK")
</pallas_src>

<mosaic_0001>
module attributes {stable_mosaic.version = 11 : i64} {
  func.func @_fused_kernel(%arg0: i32, %arg1: i32, %arg2: memref<1x1x32xf32, #tpu.memory_space<vmem>>, %arg3: memref<1x1x32xf32, #tpu.memory_space<vmem>>, %arg4: memref<1x128x128xf32, #tpu.memory_space<vmem>>, %arg5: memref<64x64xf32, #tpu.memory_space<vmem>>, %arg6: memref<1x64xf32, #tpu.memory_space<vmem>>, %arg7: memref<64x64xf32, #tpu.memory_space<vmem>>, %arg8: memref<1x64xf32, #tpu.memory_space<vmem>>, %arg9: memref<64x64xf32, #tpu.memory_space<vmem>>, %arg10: memref<1x64xf32, #tpu.memory_space<vmem>>, %arg11: memref<64x64xf32, #tpu.memory_space<vmem>>, %arg12: memref<1x64xf32, #tpu.memory_space<vmem>>, %arg13: memref<64x1xf32, #tpu.memory_space<vmem>>, %arg14: memref<1x1x1xf32, #tpu.memory_space<vmem>>, %arg15: memref<8x128xf32, #tpu.memory_space<vmem>>) attributes {dimension_semantics = [#tpu.dimension_semantics<parallel>, #tpu.dimension_semantics<arbitrary>], iteration_bounds = array<i64: 2, 1>, scalar_prefetch = 0 : i64, scratch_operands = 1 : i64, tpu.core_type = #tpu.core_type<tc>, window_params = [{transform_indices = @transform_0, window_bounds = array<i64: 1, 1, 32>}, {transform_indices = @transform_1, window_bounds = array<i64: 1, 1, 32>}, {transform_indices = @transform_2, window_bounds = array<i64: 1, 128, 128>}, {pipeline_mode = #tpu.pipeline_mode<synchronous>, transform_indices = @transform_3, window_bounds = array<i64: 64, 64>}, {pipeline_mode = #tpu.pipeline_mode<synchronous>, transform_indices = @transform_4, window_bounds = array<i64: 1, 64>}, {pipeline_mode = #tpu.pipeline_mode<synchronous>, transform_indices = @transform_5, window_bounds = array<i64: 64, 64>}, {pipeline_mode = #tpu.pipeline_mode<synchronous>, transform_indices = @transform_6, window_bounds = array<i64: 1, 64>}, {pipeline_mode = #tpu.pipeline_mode<synchronous>, transform_indices = @transform_7, window_bounds = array<i64: 64, 64>}, {pipeline_mode = #tpu.pipeline_mode<synchronous>, transform_indices = @transform_8, window_bounds = array<i64: 1, 64>}, {pipeline_mode = #tpu.pipeline_mode<synchronous>, transform_indices = @transform_9, window_bounds = array<i64: 64, 64>}, {pipeline_mode = #tpu.pipeline_mode<synchronous>, transform_indices = @transform_10, window_bounds = array<i64: 1, 64>}, {pipeline_mode = #tpu.pipeline_mode<synchronous>, transform_indices = @transform_11, window_bounds = array<i64: 64, 1>}, {transform_indices = @transform_12, window_bounds = array<i64: 1, 1, 1>}]} {
    %c0_i32 = arith.constant 0 : i32
    %0 = arith.cmpi eq, %arg1, %c0_i32 : i32
    %1 = arith.extui %0 : i1 to i32
    %c0_i32_0 = arith.constant 0 : i32
    %2 = arith.cmpi ne, %1, %c0_i32_0 : i32
    scf.if %2 {
      %cst_9 = arith.constant 0.000000e+00 : f32
      %13 = vector.broadcast %cst_9 : f32 to vector<8x128xf32>
      %c0_10 = arith.constant 0 : index
      %c0_11 = arith.constant 0 : index
      %14 = vector.load %arg15[%c0_10, %c0_11] : memref<8x128xf32, #tpu.memory_space<vmem>>, vector<8x128xf32>
      tpu.vector_store %arg15[%c0_10, %c0_11], %13 {strides = array<i32>} : memref<8x128xf32, #tpu.memory_space<vmem>>, vector<8x128xf32>,
    } else {
    }
    %c0 = arith.constant 0 : index
    %c0_1 = arith.constant 0 : index
    %c0_2 = arith.constant 0 : index
    %3 = vector.load %arg4[%c0, %c0_1, %c0_2] : memref<1x128x128xf32, #tpu.memory_space<vmem>>, vector<1x128x128xf32>
    %c0_3 = arith.constant 0 : index
    %c0_4 = arith.constant 0 : index
    %4 = vector.load %arg15[%c0_3, %c0_4] : memref<8x128xf32, #tpu.memory_space<vmem>>, vector<8x128xf32>
    %5 = vector.shape_cast %3 : vector<1x128x128xf32> to vector<128x128xf32>
    %6 = vector.shape_cast %5 : vector<128x128xf32> to vector<16x8x128xf32>
    %cst = arith.constant dense<0.000000e+00> : vector<8x128xf32>
    %7 = vector.multi_reduction <add>, %6, %cst [0] : vector<16x8x128xf32> to vector<8x128xf32>
    %8 = arith.addf %4, %7 : vector<8x128xf32>
    %c0_5 = arith.constant 0 : index
    %c0_6 = arith.constant 0 : index
    %9 = vector.load %arg15[%c0_5, %c0_6] : memref<8x128xf32, #tpu.memory_space<vmem>>, vector<8x128xf32>
    tpu.vector_store %arg15[%c0_5, %c0_6], %8 {strides = array<i32>} : memref<8x128xf32, #tpu.memory_space<vmem>>, vector<8x128xf32>,
    %c0_i32_7 = arith.constant 0 : i32
    %10 = arith.cmpi eq, %arg1, %c0_i32_7 : i32
    %11 = arith.extui %10 : i1 to i32
    %c0_i32_8 = arith.constant 0 : i32
    %12 = arith.cmpi ne, %11, %c0_i32_8 : i32
    scf.if %12 {
      %c0_9 = arith.constant 0 : index
      %c0_10 = arith.constant 0 : index
      %13 = vector.load %arg15[%c0_9, %c0_10] : memref<8x128xf32, #tpu.memory_space<vmem>>, vector<8x128xf32>
      %cst_11 = arith.constant dense<0.000000e+00> : vector<128xf32>
      %14 = vector.multi_reduction <add>, %13, %cst_11 [0] : vector<8x128xf32> to vector<128xf32>
      %15 = vector.shape_cast %14 : vector<128xf32> to vector<1x128xf32>
      %16 = vector.extract_strided_slice %15 {offsets = [0, 0], sizes = [1, 32], strides = [1, 1]} : vector<1x128xf32> to vector<1x32xf32>
      %17 = vector.extract_strided_slice %15 {offsets = [0, 32], sizes = [1, 32], strides = [1, 1]} : vector<1x128xf32> to vector<1x32xf32>
      %18 = arith.addf %16, %17 : vector<1x32xf32>
      %19 = vector.extract_strided_slice %15 {offsets = [0, 64], sizes = [1, 32], strides = [1, 1]} : vector<1x128xf32> to vector<1x32xf32>
      %20 = arith.addf %18, %19 : vector<1x32xf32>
      %21 = vector.extract_strided_slice %15 {offsets = [0, 96], sizes = [1, 32], strides = [1, 1]} : vector<1x128xf32> to vector<1x32xf32>
      %22 = arith.addf %20, %21 : vector<1x32xf32>
      %c0_12 = arith.constant 0 : index
      %c0_13 = arith.constant 0 : index
      %c0_14 = arith.constant 0 : index
      %23 = vector.load %arg3[%c0_12, %c0_13, %c0_14] : memref<1x1x32xf32, #tpu.memory_space<vmem>>, vector<1x1x32xf32>
      %24 = vector.shape_cast %23 : vector<1x1x32xf32> to vector<1x32xf32>
      %25 = arith.addf %22, %24 : vector<1x32xf32>
      %c0_15 = arith.constant 0 : index
      %c0_16 = arith.constant 0 : index
      %c0_17 = arith.constant 0 : index
      %26 = vector.load %arg2[%c0_15, %c0_16, %c0_17] : memref<1x1x32xf32, #tpu.memory_space<vmem>>, vector<1x1x32xf32>
      %27 = vector.shape_cast %26 : vector<1x1x32xf32> to vector<1x32xf32>
      %28 = arith.subf %25, %27 : vector<1x32xf32>
      %29 = tpu.concatenate %27, %28 in 1 : vector<1x32xf32>, vector<1x32xf32> -> vector<1x64xf32>
      %c0_18 = arith.constant 0 : index
      %c0_19 = arith.constant 0 : index
      %30 = vector.load %arg5[%c0_18, %c0_19] : memref<64x64xf32, #tpu.memory_space<vmem>>, vector<64x64xf32>
      %cst_20 = arith.constant dense<0.000000e+00> : vector<1x64xf32>
      %31 = tpu.matmul %29, %30, %cst_20 {dimension_numbers = #tpu.dot_dimension_numbers<[1], [0], [0], [1], [0, 0, 1, 1], [], []>} : vector<1x64xf32>, vector<64x64xf32>, vector<1x64xf32> -> vector<1x64xf32>
      %c0_21 = arith.constant 0 : index
      %c0_22 = arith.constant 0 : index
      %32 = vector.load %arg6[%c0_21, %c0_22] : memref<1x64xf32, #tpu.memory_space<vmem>>, vector<1x64xf32>
      %33 = arith.addf %31, %32 : vector<1x64xf32>
      %cst_23 = arith.constant 0.000000e+00 : f32
      %34 = vector.broadcast %cst_23 : f32 to vector<1x64xf32>
      %35 = arith.maximumf %33, %34 : vector<1x64xf32>
      %c0_24 = arith.constant 0 : index
      %c0_25 = arith.constant 0 : index
      %36 = vector.load %arg7[%c0_24, %c0_25] : memref<64x64xf32, #tpu.memory_space<vmem>>, vector<64x64xf32>
      %cst_26 = arith.constant dense<0.000000e+00> : vector<1x64xf32>
      %37 = tpu.matmul %35, %36, %cst_26 {dimension_numbers = #tpu.dot_dimension_numbers<[1], [0], [0], [1], [0, 0, 1, 1], [], []>} : vector<1x64xf32>, vector<64x64xf32>, vector<1x64xf32> -> vector<1x64xf32>
      %38 = arith.addf %29, %37 : vector<1x64xf32>
      %c0_27 = arith.constant 0 : index
      %c0_28 = arith.constant 0 : index
      %39 = vector.load %arg8[%c0_27, %c0_28] : memref<1x64xf32, #tpu.memory_space<vmem>>, vector<1x64xf32>
      %40 = arith.addf %38, %39 : vector<1x64xf32>
      %cst_29 = arith.constant 0.000000e+00 : f32
      %41 = vector.broadcast %cst_29 : f32 to vector<1x64xf32>
      %42 = arith.maximumf %40, %41 : vector<1x64xf32>
      %c0_30 = arith.constant 0 : index
      %c0_31 = arith.constant 0 : index
      %43 = vector.load %arg9[%c0_30, %c0_31] : memref<64x64xf32, #tpu.memory_space<vmem>>, vector<64x64xf32>
      %cst_32 = arith.constant dense<0.000000e+00> : vector<1x64xf32>
      %44 = tpu.matmul %42, %43, %cst_32 {dimension_numbers = #tpu.dot_dimension_numbers<[1], [0], [0], [1], [0, 0, 1, 1], [], []>} : vector<1x64xf32>, vector<64x64xf32>, vector<1x64xf32> -> vector<1x64xf32>
      %c0_33 = arith.constant 0 : index
      %c0_34 = arith.constant 0 : index
      %45 = vector.load %arg10[%c0_33, %c0_34] : memref<1x64xf32, #tpu.memory_space<vmem>>, vector<1x64xf32>
      %46 = arith.addf %44, %45 : vector<1x64xf32>
      %cst_35 = arith.constant 0.000000e+00 : f32
      %47 = vector.broadcast %cst_35 : f32 to vector<1x64xf32>
      %48 = arith.maximumf %46, %47 : vector<1x64xf32>
      %c0_36 = arith.constant 0 : index
      %c0_37 = arith.constant 0 : index
      %49 = vector.load %arg11[%c0_36, %c0_37] : memref<64x64xf32, #tpu.memory_space<vmem>>, vector<64x64xf32>
      %cst_38 = arith.constant dense<0.000000e+00> : vector<1x64xf32>
      %50 = tpu.matmul %48, %49, %cst_38 {dimension_numbers = #tpu.dot_dimension_numbers<[1], [0], [0], [1], [0, 0, 1, 1], [], []>} : vector<1x64xf32>, vector<64x64xf32>, vector<1x64xf32> -> vector<1x64xf32>
      %51 = arith.addf %42, %50 : vector<1x64xf32>
      %c0_39 = arith.constant 0 : index
      %c0_40 = arith.constant 0 : index
      %52 = vector.load %arg12[%c0_39, %c0_40] : memref<1x64xf32, #tpu.memory_space<vmem>>, vector<1x64xf32>
      %53 = arith.addf %51, %52 : vector<1x64xf32>
      %c0_41 = arith.constant 0 : index
      %c0_42 = arith.constant 0 : index
      %54 = vector.load %arg13[%c0_41, %c0_42] : memref<64x1xf32, #tpu.memory_space<vmem>>, vector<64x1xf32>
      %cst_43 = arith.constant dense<0.000000e+00> : vector<1x1xf32>
      %55 = tpu.matmul %53, %54, %cst_43 {dimension_numbers = #tpu.dot_dimension_numbers<[1], [0], [0], [1], [0, 0, 1, 1], [], []>} : vector<1x64xf32>, vector<64x1xf32>, vector<1x1xf32> -> vector<1x1xf32>
      %c0_44 = arith.constant 0 : index
      %c0_45 = arith.constant 0 : index
      %c0_46 = arith.constant 0 : index
      %56 = vector.load %arg14[%c0_44, %c0_45, %c0_46] : memref<1x1x1xf32, #tpu.memory_space<vmem>>, vector<1x1x1xf32>
      %57 = vector.shape_cast %56 : vector<1x1x1xf32> to vector<1x1xf32>
      %58 = vector.shape_cast %55 : vector<1x1xf32> to vector<1x1x1xf32>
      tpu.vector_store %arg14[%c0_44, %c0_45, %c0_46], %58 {strides = array<i32>} : memref<1x1x1xf32, #tpu.memory_space<vmem>>, vector<1x1x1xf32>,
    } else {
    }
    return
  }
  func.func @transform_0(%arg0: i32, %arg1: i32) -> (i32, i32, i32) {
    %c0_i32 = arith.constant 0 : i32
    %c0_i32_0 = arith.constant 0 : i32
    %c0_i32_1 = arith.constant 0 : i32
    return %arg0, %c0_i32, %c0_i32_0 : i32, i32, i32
  }
  func.func @transform_1(%arg0: i32, %arg1: i32) -> (i32, i32, i32) {
    %c0_i32 = arith.constant 0 : i32
    %c0_i32_0 = arith.constant 0 : i32
    %c0_i32_1 = arith.constant 0 : i32
    return %arg0, %c0_i32, %c0_i32_0 : i32, i32, i32
  }
  func.func @transform_2(%arg0: i32, %arg1: i32) -> (i32, i32, i32) {
    %c0_i32 = arith.constant 0 : i32
    %c0_i32_0 = arith.constant 0 : i32
    return %arg0, %arg1, %c0_i32 : i32, i32, i32
  }
  func.func @transform_3(%arg0: i32, %arg1: i32) -> (i32, i32) {
    %c0_i32 = arith.constant 0 : i32
    %c0_i32_0 = arith.constant 0 : i32
    %c0_i32_1 = arith.constant 0 : i32
    return %c0_i32, %c0_i32_0 : i32, i32
  }
  func.func @transform_4(%arg0: i32, %arg1: i32) -> (i32, i32) {
    %c0_i32 = arith.constant 0 : i32
    %c0_i32_0 = arith.constant 0 : i32
    %c0_i32_1 = arith.constant 0 : i32
    return %c0_i32, %c0_i32_0 : i32, i32
  }
  func.func @transform_5(%arg0: i32, %arg1: i32) -> (i32, i32) {
    %c0_i32 = arith.constant 0 : i32
    %c0_i32_0 = arith.constant 0 : i32
    %c0_i32_1 = arith.constant 0 : i32
    return %c0_i32, %c0_i32_0 : i32, i32
  }
  func.func @transform_6(%arg0: i32, %arg1: i32) -> (i32, i32) {
    %c0_i32 = arith.constant 0 : i32
    %c0_i32_0 = arith.constant 0 : i32
    %c0_i32_1 = arith.constant 0 : i32
    return %c0_i32, %c0_i32_0 : i32, i32
  }
  func.func @transform_7(%arg0: i32, %arg1: i32) -> (i32, i32) {
    %c0_i32 = arith.constant 0 : i32
    %c0_i32_0 = arith.constant 0 : i32
    %c0_i32_1 = arith.constant 0 : i32
    return %c0_i32, %c0_i32_0 : i32, i32
  }
  func.func @transform_8(%arg0: i32, %arg1: i32) -> (i32, i32) {
    %c0_i32 = arith.constant 0 : i32
    %c0_i32_0 = arith.constant 0 : i32
    %c0_i32_1 = arith.constant 0 : i32
    return %c0_i32, %c0_i32_0 : i32, i32
  }
  func.func @transform_9(%arg0: i32, %arg1: i32) -> (i32, i32) {
    %c0_i32 = arith.constant 0 : i32
    %c0_i32_0 = arith.constant 0 : i32
    %c0_i32_1 = arith.constant 0 : i32
    return %c0_i32, %c0_i32_0 : i32, i32
  }
  func.func @transform_10(%arg0: i32, %arg1: i32) -> (i32, i32) {
    %c0_i32 = arith.constant 0 : i32
    %c0_i32_0 = arith.constant 0 : i32
    %c0_i32_1 = arith.constant 0 : i32
    return %c0_i32, %c0_i32_0 : i32, i32
  }
  func.func @transform_11(%arg0: i32, %arg1: i32) -> (i32, i32) {
    %c0_i32 = arith.constant 0 : i32
    %c0_i32_0 = arith.constant 0 : i32
    %c0_i32_1 = arith.constant 0 : i32
    return %c0_i32, %c0_i32_0 : i32, i32
  }
  func.func @transform_12(%arg0: i32, %arg1: i32) -> (i32, i32, i32) {
    %c0_i32 = arith.constant 0 : i32
    %c0_i32_0 = arith.constant 0 : i32
    %c0_i32_1 = arith.constant 0 : i32
    return %arg0, %c0_i32, %c0_i32_0 : i32, i32, i32
  }
}

module attributes {stable_mosaic.version = 11 : i64} {
  func.func @_fused_kernel(%arg0: i32, %arg1: i32, %arg2: memref<1x1x32xf32, #tpu.memory_space<vmem>>, %arg3: memref<1x1x32xf32, #tpu.memory_space<vmem>>, %arg4: memref<1x128x128xf32, #tpu.memory_space<vmem>>, %arg5: memref<64x64xf32, #tpu.memory_space<vmem>>, %arg6: memref<1x64xf32, #tpu.memory_space<vmem>>, %arg7: memref<64x64xf32, #tpu.memory_space<vmem>>, %arg8: memref<1x64xf32, #tpu.memory_space<vmem>>, %arg9: memref<64x64xf32, #tpu.memory_space<vmem>>, %arg10: memref<1x64xf32, #tpu.memory_space<vmem>>, %arg11: memref<64x64xf32, #tpu.memory_space<vmem>>, %arg12: memref<1x64xf32, #tpu.memory_space<vmem>>, %arg13: memref<64x1xf32, #tpu.memory_space<vmem>>, %arg14: memref<1x1x1xf32, #tpu.memory_space<vmem>>, %arg15: memref<8x128xf32, #tpu.memory_space<vmem>>) attributes {dimension_semantics = [#tpu.dimension_semantics<parallel>, #tpu.dimension_semantics<arbitrary>], iteration_bounds = array<i64: 2, 1>, scalar_prefetch = 0 : i64, scratch_operands = 1 : i64, tpu.core_type = #tpu.core_type<tc>, window_params = [{transform_indices = @transform_0, window_bounds = array<i64: 1, 1, 32>}, {transform_indices = @transform_1, window_bounds = array<i64: 1, 1, 32>}, {transform_indices = @transform_2, window_bounds = array<i64: 1, 128, 128>}, {pipeline_mode = #tpu.pipeline_mode<synchronous>, transform_indices = @transform_3, window_bounds = array<i64: 64, 64>}, {pipeline_mode = #tpu.pipeline_mode<synchronous>, transform_indices = @transform_4, window_bounds = array<i64: 1, 64>}, {pipeline_mode = #tpu.pipeline_mode<synchronous>, transform_indices = @transform_5, window_bounds = array<i64: 64, 64>}, {pipeline_mode = #tpu.pipeline_mode<synchronous>, transform_indices = @transform_6, window_bounds = array<i64: 1, 64>}, {pipeline_mode = #tpu.pipeline_mode<synchronous>, transform_indices = @transform_7, window_bounds = array<i64: 64, 64>}, {pipeline_mode = #tpu.pipeline_mode<synchronous>, transform_indices = @transform_8, window_bounds = array<i64: 1, 64>}, {pipeline_mode = #tpu.pipeline_mode<synchronous>, transform_indices = @transform_9, window_bounds = array<i64: 64, 64>}, {pipeline_mode = #tpu.pipeline_mode<synchronous>, transform_indices = @transform_10, window_bounds = array<i64: 1, 64>}, {pipeline_mode = #tpu.pipeline_mode<synchronous>, transform_indices = @transform_11, window_bounds = array<i64: 64, 1>}, {transform_indices = @transform_12, window_bounds = array<i64: 1, 1, 1>}]} {
    %c0_i32 = arith.constant 0 : i32
    %0 = arith.cmpi eq, %arg1, %c0_i32 : i32
    %1 = arith.extui %0 : i1 to i32
    %c0_i32_0 = arith.constant 0 : i32
    %2 = arith.cmpi ne, %1, %c0_i32_0 : i32
    scf.if %2 {
      %cst_9 = arith.constant 0.000000e+00 : f32
      %13 = vector.broadcast %cst_9 : f32 to vector<8x128xf32>
      %c0_10 = arith.constant 0 : index
      %c0_11 = arith.constant 0 : index
      %14 = vector.load %arg15[%c0_10, %c0_11] : memref<8x128xf32, #tpu.memory_space<vmem>>, vector<8x128xf32>
      tpu.vector_store %arg15[%c0_10, %c0_11], %13 {strides = array<i32>} : memref<8x128xf32, #tpu.memory_space<vmem>>, vector<8x128xf32>,
    } else {
    }
    %c0 = arith.constant 0 : index
    %c0_1 = arith.constant 0 : index
    %c0_2 = arith.constant 0 : index
    %3 = vector.load %arg4[%c0, %c0_1, %c0_2] : memref<1x128x128xf32, #tpu.memory_space<vmem>>, vector<1x128x128xf32>
    %c0_3 = arith.constant 0 : index
    %c0_4 = arith.constant 0 : index
    %4 = vector.load %arg15[%c0_3, %c0_4] : memref<8x128xf32, #tpu.memory_space<vmem>>, vector<1x128xf32>
    %5 = vector.shape_cast %3 : vector<1x128x128xf32> to vector<128x128xf32>
    %cst = arith.constant dense<0.000000e+00> : vector<128xf32>
    %6 = vector.multi_reduction <add>, %5, %cst [0] : vector<128x128xf32> to vector<128xf32>
    %7 = vector.shape_cast %6 : vector<128xf32> to vector<1x128xf32>
    %8 = arith.addf %4, %7 : vector<1x128xf32>
    %c0_5 = arith.constant 0 : index
    %c0_6 = arith.constant 0 : index
    %9 = vector.load %arg15[%c0_5, %c0_6] : memref<8x128xf32, #tpu.memory_space<vmem>>, vector<1x128xf32>
    tpu.vector_store %arg15[%c0_5, %c0_6], %8 {strides = array<i32>} : memref<8x128xf32, #tpu.memory_space<vmem>>, vector<1x128xf32>,
    %c0_i32_7 = arith.constant 0 : i32
    %10 = arith.cmpi eq, %arg1, %c0_i32_7 : i32
    %11 = arith.extui %10 : i1 to i32
    %c0_i32_8 = arith.constant 0 : i32
    %12 = arith.cmpi ne, %11, %c0_i32_8 : i32
    scf.if %12 {
      %c0_9 = arith.constant 0 : index
      %c0_10 = arith.constant 0 : index
      %13 = vector.load %arg15[%c0_9, %c0_10] : memref<8x128xf32, #tpu.memory_space<vmem>>, vector<8x128xf32>
      %cst_11 = arith.constant dense<0.000000e+00> : vector<128xf32>
      %14 = vector.multi_reduction <add>, %13, %cst_11 [0] : vector<8x128xf32> to vector<128xf32>
      %15 = vector.shape_cast %14 : vector<128xf32> to vector<1x128xf32>
      %16 = vector.extract_strided_slice %15 {offsets = [0, 0], sizes = [1, 32], strides = [1, 1]} : vector<1x128xf32> to vector<1x32xf32>
      %17 = vector.extract_strided_slice %15 {offsets = [0, 32], sizes = [1, 32], strides = [1, 1]} : vector<1x128xf32> to vector<1x32xf32>
      %18 = arith.addf %16, %17 : vector<1x32xf32>
      %19 = vector.extract_strided_slice %15 {offsets = [0, 64], sizes = [1, 32], strides = [1, 1]} : vector<1x128xf32> to vector<1x32xf32>
      %20 = arith.addf %18, %19 : vector<1x32xf32>
      %21 = vector.extract_strided_slice %15 {offsets = [0, 96], sizes = [1, 32], strides = [1, 1]} : vector<1x128xf32> to vector<1x32xf32>
      %22 = arith.addf %20, %21 : vector<1x32xf32>
      %c0_12 = arith.constant 0 : index
      %c0_13 = arith.constant 0 : index
      %c0_14 = arith.constant 0 : index
      %23 = vector.load %arg3[%c0_12, %c0_13, %c0_14] : memref<1x1x32xf32, #tpu.memory_space<vmem>>, vector<1x1x32xf32>
      %24 = vector.shape_cast %23 : vector<1x1x32xf32> to vector<1x32xf32>
      %25 = arith.addf %22, %24 : vector<1x32xf32>
      %c0_15 = arith.constant 0 : index
      %c0_16 = arith.constant 0 : index
      %c0_17 = arith.constant 0 : index
      %26 = vector.load %arg2[%c0_15, %c0_16, %c0_17] : memref<1x1x32xf32, #tpu.memory_space<vmem>>, vector<1x1x32xf32>
      %27 = vector.shape_cast %26 : vector<1x1x32xf32> to vector<1x32xf32>
      %28 = arith.subf %25, %27 : vector<1x32xf32>
      %29 = tpu.concatenate %27, %28 in 1 : vector<1x32xf32>, vector<1x32xf32> -> vector<1x64xf32>
      %c0_18 = arith.constant 0 : index
      %c0_19 = arith.constant 0 : index
      %30 = vector.load %arg5[%c0_18, %c0_19] : memref<64x64xf32, #tpu.memory_space<vmem>>, vector<64x64xf32>
      %cst_20 = arith.constant dense<0.000000e+00> : vector<1x64xf32>
      %31 = tpu.matmul %29, %30, %cst_20 {dimension_numbers = #tpu.dot_dimension_numbers<[1], [0], [0], [1], [0, 0, 1, 1], [], []>} : vector<1x64xf32>, vector<64x64xf32>, vector<1x64xf32> -> vector<1x64xf32>
      %c0_21 = arith.constant 0 : index
      %c0_22 = arith.constant 0 : index
      %32 = vector.load %arg6[%c0_21, %c0_22] : memref<1x64xf32, #tpu.memory_space<vmem>>, vector<1x64xf32>
      %33 = arith.addf %31, %32 : vector<1x64xf32>
      %cst_23 = arith.constant 0.000000e+00 : f32
      %34 = vector.broadcast %cst_23 : f32 to vector<1x64xf32>
      %35 = arith.maximumf %33, %34 : vector<1x64xf32>
      %c0_24 = arith.constant 0 : index
      %c0_25 = arith.constant 0 : index
      %36 = vector.load %arg7[%c0_24, %c0_25] : memref<64x64xf32, #tpu.memory_space<vmem>>, vector<64x64xf32>
      %cst_26 = arith.constant dense<0.000000e+00> : vector<1x64xf32>
      %37 = tpu.matmul %35, %36, %cst_26 {dimension_numbers = #tpu.dot_dimension_numbers<[1], [0], [0], [1], [0, 0, 1, 1], [], []>} : vector<1x64xf32>, vector<64x64xf32>, vector<1x64xf32> -> vector<1x64xf32>
      %38 = arith.addf %29, %37 : vector<1x64xf32>
      %c0_27 = arith.constant 0 : index
      %c0_28 = arith.constant 0 : index
      %39 = vector.load %arg8[%c0_27, %c0_28] : memref<1x64xf32, #tpu.memory_space<vmem>>, vector<1x64xf32>
      %40 = arith.addf %38, %39 : vector<1x64xf32>
      %cst_29 = arith.constant 0.000000e+00 : f32
      %41 = vector.broadcast %cst_29 : f32 to vector<1x64xf32>
      %42 = arith.maximumf %40, %41 : vector<1x64xf32>
      %c0_30 = arith.constant 0 : index
      %c0_31 = arith.constant 0 : index
      %43 = vector.load %arg9[%c0_30, %c0_31] : memref<64x64xf32, #tpu.memory_space<vmem>>, vector<64x64xf32>
      %cst_32 = arith.constant dense<0.000000e+00> : vector<1x64xf32>
      %44 = tpu.matmul %42, %43, %cst_32 {dimension_numbers = #tpu.dot_dimension_numbers<[1], [0], [0], [1], [0, 0, 1, 1], [], []>} : vector<1x64xf32>, vector<64x64xf32>, vector<1x64xf32> -> vector<1x64xf32>
      %c0_33 = arith.constant 0 : index
      %c0_34 = arith.constant 0 : index
      %45 = vector.load %arg10[%c0_33, %c0_34] : memref<1x64xf32, #tpu.memory_space<vmem>>, vector<1x64xf32>
      %46 = arith.addf %44, %45 : vector<1x64xf32>
      %cst_35 = arith.constant 0.000000e+00 : f32
      %47 = vector.broadcast %cst_35 : f32 to vector<1x64xf32>
      %48 = arith.maximumf %46, %47 : vector<1x64xf32>
      %c0_36 = arith.constant 0 : index
      %c0_37 = arith.constant 0 : index
      %49 = vector.load %arg11[%c0_36, %c0_37] : memref<64x64xf32, #tpu.memory_space<vmem>>, vector<64x64xf32>
      %cst_38 = arith.constant dense<0.000000e+00> : vector<1x64xf32>
      %50 = tpu.matmul %48, %49, %cst_38 {dimension_numbers = #tpu.dot_dimension_numbers<[1], [0], [0], [1], [0, 0, 1, 1], [], []>} : vector<1x64xf32>, vector<64x64xf32>, vector<1x64xf32> -> vector<1x64xf32>
      %51 = arith.addf %42, %50 : vector<1x64xf32>
      %c0_39 = arith.constant 0 : index
      %c0_40 = arith.constant 0 : index
      %52 = vector.load %arg12[%c0_39, %c0_40] : memref<1x64xf32, #tpu.memory_space<vmem>>, vector<1x64xf32>
      %53 = arith.addf %51, %52 : vector<1x64xf32>
      %c0_41 = arith.constant 0 : index
      %c0_42 = arith.constant 0 : index
      %54 = vector.load %arg13[%c0_41, %c0_42] : memref<64x1xf32, #tpu.memory_space<vmem>>, vector<64x1xf32>
      %cst_43 = arith.constant dense<0.000000e+00> : vector<1x1xf32>
      %55 = tpu.matmul %53, %54, %cst_43 {dimension_numbers = #tpu.dot_dimension_numbers<[1], [0], [0], [1], [0, 0, 1, 1], [], []>} : vector<1x64xf32>, vector<64x1xf32>, vector<1x1xf32> -> vector<1x1xf32>
      %c0_44 = arith.constant 0 : index
      %c0_45 = arith.constant 0 : index
      %c0_46 = arith.constant 0 : index
      %56 = vector.load %arg14[%c0_44, %c0_45, %c0_46] : memref<1x1x1xf32, #tpu.memory_space<vmem>>, vector<1x1x1xf32>
      %57 = vector.shape_cast %56 : vector<1x1x1xf32> to vector<1x1xf32>
      %58 = vector.shape_cast %55 : vector<1x1xf32> to vector<1x1x1xf32>
      tpu.vector_store %arg14[%c0_44, %c0_45, %c0_46], %58 {strides = array<i32>} : memref<1x1x1xf32, #tpu.memory_space<vmem>>, vector<1x1x1xf32>,
    } else {
    }
    return
  }
  func.func @transform_0(%arg0: i32, %arg1: i32) -> (i32, i32, i32) {
    %c0_i32 = arith.constant 0 : i32
    %c0_i32_0 = arith.constant 0 : i32
    %c0_i32_1 = arith.constant 0 : i32
    return %arg0, %c0_i32, %c0_i32_0 : i32, i32, i32
  }
  func.func @transform_1(%arg0: i32, %arg1: i32) -> (i32, i32, i32) {
    %c0_i32 = arith.constant 0 : i32
    %c0_i32_0 = arith.constant 0 : i32
    %c0_i32_1 = arith.constant 0 : i32
    return %arg0, %c0_i32, %c0_i32_0 : i32, i32, i32
  }
  func.func @transform_2(%arg0: i32, %arg1: i32) -> (i32, i32, i32) {
    %c0_i32 = arith.constant 0 : i32
    %c0_i32_0 = arith.constant 0 : i32
    return %arg0, %arg1, %c0_i32 : i32, i32, i32
  }
  func.func @transform_3(%arg0: i32, %arg1: i32) -> (i32, i32) {
    %c0_i32 = arith.constant 0 : i32
    %c0_i32_0 = arith.constant 0 : i32
    %c0_i32_1 = arith.constant 0 : i32
    return %c0_i32, %c0_i32_0 : i32, i32
  }
  func.func @transform_4(%arg0: i32, %arg1: i32) -> (i32, i32) {
    %c0_i32 = arith.constant 0 : i32
    %c0_i32_0 = arith.constant 0 : i32
    %c0_i32_1 = arith.constant 0 : i32
    return %c0_i32, %c0_i32_0 : i32, i32
  }
  func.func @transform_5(%arg0: i32, %arg1: i32) -> (i32, i32) {
    %c0_i32 = arith.constant 0 : i32
    %c0_i32_0 = arith.constant 0 : i32
    %c0_i32_1 = arith.constant 0 : i32
    return %c0_i32, %c0_i32_0 : i32, i32
  }
  func.func @transform_6(%arg0: i32, %arg1: i32) -> (i32, i32) {
    %c0_i32 = arith.constant 0 : i32
    %c0_i32_0 = arith.constant 0 : i32
    %c0_i32_1 = arith.constant 0 : i32
    return %c0_i32, %c0_i32_0 : i32, i32
  }
  func.func @transform_7(%arg0: i32, %arg1: i32) -> (i32, i32) {
    %c0_i32 = arith.constant 0 : i32
    %c0_i32_0 = arith.constant 0 : i32
    %c0_i32_1 = arith.constant 0 : i32
    return %c0_i32, %c0_i32_0 : i32, i32
  }
  func.func @transform_8(%arg0: i32, %arg1: i32) -> (i32, i32) {
    %c0_i32 = arith.constant 0 : i32
    %c0_i32_0 = arith.constant 0 : i32
    %c0_i32_1 = arith.constant 0 : i32
    return %c0_i32, %c0_i32_0 : i32, i32
  }
  func.func @transform_9(%arg0: i32, %arg1: i32) -> (i32, i32) {
    %c0_i32 = arith.constant 0 : i32
    %c0_i32_0 = arith.constant 0 : i32
    %c0_i32_1 = arith.constant 0 : i32
    return %c0_i32, %c0_i32_0 : i32, i32
  }
  func.func @transform_10(%arg0: i32, %arg1: i32) -> (i32, i32) {
    %c0_i32 = arith.constant 0 : i32
    %c0_i32_0 = arith.constant 0 : i32
    %c0_i32_1 = arith.constant 0 : i32
    return %c0_i32, %c0_i32_0 : i32, i32
  }
  func.func @transform_11(%arg0: i32, %arg1: i32) -> (i32, i32) {
    %c0_i32 = arith.constant 0 : i32
    %c0_i32_0 = arith.constant 0 : i32
    %c0_i32_1 = arith.constant 0 : i32
    return %c0_i32, %c0_i32_0 : i32, i32
  }
  func.func @transform_12(%arg0: i32, %arg1: i32) -> (i32, i32, i32) {
    %c0_i32 = arith.constant 0 : i32
    %c0_i32_0 = arith.constant 0 : i32
    %c0_i32_1 = arith.constant 0 : i32
    return %arg0, %c0_i32, %c0_i32_0 : i32, i32, i32
  }
}

</mosaic_0001>

<bundles_post_ra>
// kernel: tpu_custom_call.1
= control target key start
LH: loop header
LB: loop body
LE: loop exit
PB: predicated region body
PF: predicated region fallthrough
CT: control target
= control target key end

     0   :  { %s1578_s0 = inlined_call_operand.vmem [shape: f32[2,1,32], index: 0, kind: input, shape index: {}]   ;;  %s1579_s1 = inlined_call_operand.hbm [shape: f32[2,1,32], index: 1, kind: input, shape index: {}]   ;;  %s1580_s2 = inlined_call_operand.hbm [shape: f32[2,128,128], index: 2, kind: input, shape index: {}]   ;;  %s1581_s3 = inlined_call_operand.vmem [shape: f32[64,64], index: 3, kind: input, shape index: {}]   ;;  %s1582_s4 = inlined_call_operand.vmem [shape: f32[1,64], index: 4, kind: input, shape index: {}]   ;;  %s1583_s5 = inlined_call_operand.hbm [shape: f32[64,64], index: 5, kind: input, shape index: {}]   ;;  %s1584_s6 = inlined_call_operand.vmem [shape: f32[1,64], index: 6, kind: input, shape index: {}]   ;;  %s1585_s7 = inlined_call_operand.hbm [shape: f32[64,64], index: 7, kind: input, shape index: {}]   ;;  %s1586_s8 = inlined_call_operand.vmem [shape: f32[1,64], index: 8, kind: input, shape index: {}]   ;;  %s1587_s9 = inlined_call_operand.hbm [shape: f32[64,64], index: 9, kind: input, shape index: {}]   ;;  %s1588_s10 = inlined_call_operand.vmem [shape: f32[1,64], index: 10, kind: input, shape index: {}]   ;;  %s1589_s11 = inlined_call_operand.vmem [shape: f32[64,1], index: 11, kind: input, shape index: {}]   ;;  %s1590_s12 = inlined_call_operand.vmem [shape: f32[2,1,1], index: 12, kind: output, shape index: {}]  }
   0x1   :  { %1595 = sst [smem:[#allocation17_spill]] %s1579_s1 }
   0x2   :  { %1596 = sst [smem:[#allocation18_spill]] %s1583_s5 }
   0x3   :  { %1597 = sst [smem:[#allocation19_spill]] %s1585_s7 }
   0x4   :  { %1598 = sst [smem:[#allocation20_spill]] %s1586_s8 }
   0x5   :  { %1599 = sst [smem:[#allocation21_spill]] %s1587_s9 }
   0x6   :  { %1600 = sst [smem:[#allocation22_spill]] %s1588_s10 }
   0x7   :  { %1601 = sst [smem:[#allocation23_spill]] %s1590_s12 }
   0x8   :  { %17 = vsyncpa [#allocation4], 0 }
   0x9   :  { %19 = vsyncpa [#allocation4 + $0x1], 0 }
   0xa   :  { %20 = vsyncpa [#allocation6], 0 }
   0xb   :  { %22 = vsyncpa [#allocation6 + $0x1], 0 }
   0xc   :  { %23 = vsyncpa [#allocation9], 0  ;;  %s1320_s21 = smov 0   ;;  %s1322_s22 = smov 0  }
   0xd   :  { %s1324_s23 = smov 0   ;;  %s1326_s24 = smov 0  }
   0xe   :  { %s1328_s25 = smov 0   ;;  %s1330_s26 = smov 0  }
   0xf LB: > { %s1591_s27 = sadd.s32 4294967295, %s1245_s26   ;;  %p916_p0 = scmp.ge.s32.totalorder %s1245_s26, 1  ;;  %s1245_s26 = sphi %s1330_s26, %s29_s26   ;;  %s1241_s25 = sphi %s1328_s25, %s1625_s25   ;;  %s1237_s24 = sphi %s1326_s24, %s1624_s24   ;;  %s1233_s23 = sphi %s1324_s23, %s1623_s23   ;;  %s1229_s22 = sphi %s1322_s22, %s1622_s22   ;;  %s1225_s21 = sphi %s1320_s21, %s1621_s21  }
  0x10   : > { %p1354_p1 = scmp.eq.s32.totalorder %s1591_s27, 0  ;;  %p341_p2 = scmp.lt.s32.totalorder %s1245_s26, 3 }
  0x11   : > { %s1603_s5 = sld [smem:[#allocation18_spill]]  ;;  %s1247_s15 = smov [#allocation7]  }
  0x12   : > { %p1362_p3 = pnand %p916_p0, %p341_p2  ;;  %s360_s16 = sshll.u32 %s1247_s15, 4  ;;  %s361_s16 = int_to_ptr.vmem [resolvable:$true] %s360_s16 }
  0x13   : > { %s1606_s7 = sld [smem:[#allocation19_spill]]  ;;  %s1592_s29 = smov 128  }
  0x14   : > { %p953_p4 = pneg %p1362_p3  ;;  %s1593_s30 = smov 8  }
  0x15   : > { %s1250_s15 = smov [#allocation8]   ;;  %s1607_s9 = sld [smem:[#allocation21_spill]] }
  0x16   : > { %p1370_p5 = pnand %p953_p4, %p1354_p1  ;;  %s377_s27 = sshll.u32 %s1250_s15, 4  ;;  %s378_s27 = int_to_ptr.vmem [resolvable:$true] %s377_s27 }
  0x17   : > { %s358_s13 = sshll.u32 %s1603_s5, 4  ;;  %s74_s15 = sadd.s32 1, %s1233_s23  ;;  %s359_s13 = int_to_ptr.hbm [resolvable:$true] %s358_s13 }
  0x18   : > { %956 = dma.hbm_to_vmem [thread:$0]  (!%p1370_p5), %s359_s13, 1024, %s361_s16, [#allocation6], %s1592_s29, %s1592_s29, %s1593_s30  }
  0x19   : > { %s375_s20 = sshll.u32 %s1606_s7, 4  ;;  %s1251_s7 = smov [#allocation10]   ;;  %s376_s20 = int_to_ptr.hbm [resolvable:$true] %s375_s20 }
  0x1a   : > { %959 = dma.hbm_to_vmem [thread:$0]  (!%p1370_p5), %s376_s20, 1024, %s378_s27, [#allocation9], %s1592_s29, %s1592_s29, %s1593_s30  }
  0x1b   : > { %s392_s5 = sshll.u32 %s1607_s9, 4  ;;  %s394_s13 = sshll.u32 %s1251_s7, 4  ;;  %s393_s5 = int_to_ptr.hbm [resolvable:$true] %s392_s5  ;;  %s395_s13 = int_to_ptr.vmem [resolvable:$true] %s394_s13 }
  0x1c   : > { %962 = dma.hbm_to_vmem [thread:$0]  (!%p1370_p5), %s393_s5, 1024, %s395_s13, [#allocation9], %s1592_s29, %s1592_s29, %s1593_s30  }
  0x1d   : > { %s41_s16 = sadd.s32 1, %s1241_s25  ;;  %p81_p7 = scmp.ne.s32.totalorder %s1233_s23, %s1229_s22 }
  0x1e   : > { %p43_p6 = scmp.ge.s32.totalorder %s41_s16, 2  ;;  %p82_p8 = scmp.eq.s32.totalorder %s1245_s26, 0 }
  0x1f   : > { %p87_p10 = scmp.ne.s32.totalorder %s1229_s22, %s1225_s21  ;;  %p973_p11 = scmp.lt.s32.totalorder %s1245_s26, 2 }
  0x20   : > { %s1627_s16 = smov (%p43_p6, %s41_s16), 0  ;;  %p1402_p9 = por %p82_p8, %p81_p7 }
  0x21   : > { %1608 = sst [smem:[#allocation15_spill]] %s1627_s16  ;;  %s71_s7 = ssub.s32 %s1241_s25, %s1627_s16 }
  0x22   : > { %p72_p12 = scmp.eq.s32.totalorder %s71_s7, 0  ;;  %p1413_p13 = por %p1354_p1, %p87_p10 }
  0x23   : > { %s420_s17 = sand.u32 1, %s1233_s23   ;;  %s1611_s1 = sld [smem:[#allocation17_spill]] }
  0x24   : > { %s1423_s13 = scalar_select %p72_p12, %s1233_s23, %s74_s15  }
  0x25   : > { %s423_s30 = scalar_lea.vmem [#allocation3], %s420_s17  ;;  %p964_p0 = pnand %p973_p11, %p1402_p9 }
  0x26   : > { %1612 = sst [smem:[#allocation16_spill]] %s1423_s13  ;;  %s430_s9 = sshll.u32 %s423_s30, 4  ;;  %s431_s9 = int_to_ptr.vmem [resolvable:$true] %s430_s9 }
  0x27   : > { %s921_s21 = sshll.u32 %s420_s17, 7  ;;  %s936_s7 = sshll.u32 %s1241_s25, 7 }
  0x28   : > { %s441_s16 = scalar_lea.vmem [#allocation5], %s921_s21  ;;  %s421_s10 = scalar_lea.sflag [#allocation4], %s420_s17 }
  0x29   : > { %s426_s19 = scalar_lea.hbm %s1611_s1, %s1241_s25  ;;  %s451_s12 = sshll.u32 %s441_s16, 4  ;;  %s452_s12 = int_to_ptr.vmem [resolvable:$true] %s451_s12 }
  0x2a   : > { %s428_s29 = sshll.u32 %s426_s19, 4  ;;  %s437_s8 = sand.u32 1, %s1245_s26   ;;  %s429_s29 = int_to_ptr.hbm [resolvable:$true] %s428_s29 }
  0x2b   : > { %966 = dma.hbm_to_vmem [thread:$0]  (!%p964_p0), %s429_s29, 16, %s431_s9, %s421_s10  }
  0x2c   : > { %s448_s15 = scalar_lea.hbm %s1580_s2, %s936_s7  ;;  %s438_s19 = scalar_lea.sflag [#allocation6], %s437_s8 }
  0x2d   : > { %s449_s1 = sshll.u32 %s448_s15, 4  ;;  %s1613_s30 = smov 8   ;;  %s450_s1 = int_to_ptr.hbm [resolvable:$true] %s449_s1 }
  0x2e   : > { %s1614_s13 = smov 128   ;;  %463 = sbr.rel (%p1362_p3) target bundleno = 1011 (0x3f3), region = 68 }
  0x2f   : > { %969 = dma.hbm_to_vmem [thread:$0]  (!%p964_p0), %s450_s1, 2048, %s452_s12, %s438_s19, %s1614_s13, %s1614_s13, %s1613_s30  }
  0x30   : > { %s1438_s16 = sand.u32 (!%p1362_p3), 1, %s1229_s22  }
  0x31   : > { %s466_s9 = scalar_lea.sflag (!%p1362_p3), [#allocation4], %s1438_s16  ;;  %s468_s10 = scalar_lea.vmem (!%p1362_p3), [#allocation3], %s1438_s16 }
  0x33   : > { %1208 = dma.done.wait (%p1413_p13), %s466_s9, 16  }
  0x34   : > { %1210 = vsyncadd (%p1413_p13), %s466_s9, 4294967280  ;;  %s1615_s8 = sadd.s32 4294967295, %s1245_s26   ;;  %s925_s12 = sshll.u32 %s1438_s16, 7 }
  0x35   : > { %s474_s1 = sand.u32 1, %s1615_s8   ;;  %s1449_s29 = scalar_lea.vmem [#allocation5], %s925_s12 }
  0x36   : > { %s475_s14 = scalar_lea.sflag [#allocation6], %s474_s1 }
  0x37   : > { %1212 = dma.done.wait (%p1413_p13), %s475_s14, 2048  }
  0x38   : > { %1214 = vsyncadd (%p1413_p13), %s475_s14, 4294965248 }
  0x39   : > { %1216 = dma.done.wait (%p1354_p1), [#allocation6], 1024  }
  0x3a   : > { %1218 = vsyncadd (%p1354_p1), [#allocation6], 4294966272 }
  0x3b   : > { %1220 = dma.done.wait (%p1354_p1), [#allocation9], 2048  }
  0x3c   : > { %1222 = vsyncadd (%p1354_p1), [#allocation9], 4294965248  ;;  %v552_v0 = vld [vmem:[%s1449_s29] sm:$0xff]  ;;  %v553_v1 = vld [vmem:[%s1449_s29 + $0x8] sm:$0xff]  ;;  %s1252_s28 = smov 96   ;;  %s1253_s27 = smov 32  }
  0x3d   : > { %v554_v2 = vld [vmem:[%s1449_s29 + $0x10] sm:$0xff]  ;;  %v569_v3 = vadd.f32 %v553_v1, %v552_v0  ;;  %v555_v4 = vld [vmem:[%s1449_s29 + $0x18] sm:$0xff]  ;;  %v556_v6 = vld [vmem:[%s1449_s29 + $0x20] sm:$0xff]  ;;  %s1254_s5 = smov 64   ;;  %p540_p1 = scmp.lt.s32.totalorder %s1237_s24, 1  ;;  %vm617_vm0 = vcmask 261120  }
  0x3e   : > { %v557_v8 = vld [vmem:[%s1449_s29 + $0x28] sm:$0xff]  ;;  %v558_v10 = vld [vmem:[%s1449_s29 + $0x30] sm:$0xff]  ;;  %v559_v12 = vld [vmem:[%s1449_s29 + $0x38] sm:$0xff]  ;;  %vm628_vm1 = vcmask 523264   ;;  %s1617_s20 = sld [smem:[#allocation22_spill]]  ;;  %vm786_vm2 = vcmask 0  }
  0x3f   : > { %v570_v5 = vadd.f32 %v569_v3, %v554_v2  ;;  %v560_v14 = vld [vmem:[%s1449_s29 + $0x40] sm:$0xff]  ;;  %v561_v16 = vld [vmem:[%s1449_s29 + $0x48] sm:$0xff]  ;;  %v562_v18 = vld [vmem:[%s1449_s29 + $0x50] sm:$0xff]  ;;  %s1629_s24 = smov (!%p540_p1, %s1237_s24), 1  ;;  %s1618_s19 = sld [smem:[#allocation23_spill]] }
  0x40   : > { %v563_v20 = vld [vmem:[%s1449_s29 + $0x58] sm:$0xff]  ;;  %v564_v22 = vld [vmem:[%s1449_s29 + $0x60] sm:$0xff]  ;;  %v565_v24 = vld [vmem:[%s1449_s29 + $0x68] sm:$0xff] }
  0x41   : > { %v571_v7 = vadd.f32 %v570_v5, %v555_v4  ;;  %v566_v26 = vld [vmem:[%s1449_s29 + $0x70] sm:$0xff]  ;;  %v567_v28 = vld [vmem:[%s1449_s29 + $0x78] sm:$0xff]  ;;  %v624_v39 = vld [vmem:[%s1581_s3 + $0x28] sm:$0xff] }
  0x42   : > { %v626_v37 = vld [vmem:[%s1581_s3 + $0x38] sm:$0xff]  ;;  %v625_v38 = vld [vmem:[%s1581_s3 + $0x30] sm:$0xff]  ;;  %v623_v40 = vld [vmem:[%s1581_s3 + $0x20] sm:$0xff] }
  0x43   : > { %v572_v9 = vadd.f32 %v571_v7, %v556_v6  ;;  %640 = vmatpush.msra.mxu0 %v626_v37  ;;  %v622_v41 = vld [vmem:[%s1581_s3 + $0x18] sm:$0xff]  ;;  %v621_v42 = vld [vmem:[%s1581_s3 + $0x10] sm:$0xff]  ;;  %v620_v43 = vld [vmem:[%s1581_s3 + $0x8] sm:$0xff] }
  0x44   : > { %v609_v49 = vld [vmem:[%s468_s10] sm:$0x1]  ;;  %v659_v56 = vld [vmem:[#allocation7 + $0x30] sm:$0xff]  ;;  %v658_v57 = vld [vmem:[#allocation7 + $0x28] sm:$0xff] }
  0x45   : > { %v573_v11 = vadd.f32 %v572_v9, %v557_v8  ;;  %641 = vmatpush.msra.mxu0 %v625_v38  ;;  %v619_v54 = vld [vmem:[%s1581_s3] sm:$0xff]  ;;  %v655_v62 = vld [vmem:[#allocation7 + $0x10] sm:$0xff]  ;;  %v654_v63 = vld [vmem:[#allocation7 + $0x8] sm:$0xff]  ;;  %s546_s30 = scalar_lea.vmem %s1618_s19, %s1629_s24 }
  0x46   : > { %v660_v55 = vld [vmem:[#allocation7 + $0x38] sm:$0xff]  ;;  %v657_v58 = vld [vmem:[#allocation7 + $0x20] sm:$0xff]  ;;  %v694_v2 = vld [vmem:[#allocation8 + $0x30] sm:$0xff] }
  0x47   : > { %v574_v13 = vadd.f32 %v573_v11, %v558_v10  ;;  %642 = vmatpush.msra.mxu0 %v624_v39  ;;  %672 = vmatpush.msra.mxu1 %v660_v55  ;;  %v656_v59 = vld [vmem:[#allocation7 + $0x18] sm:$0xff]  ;;  %v653_v0 = vld [vmem:[#allocation7] sm:$0xff]  ;;  %v693_v3 = vld [vmem:[#allocation8 + $0x28] sm:$0xff] }
  0x48   : > { %v695_v1 = vld [vmem:[#allocation8 + $0x38] sm:$0xff]  ;;  %v692_v4 = vld [vmem:[#allocation8 + $0x20] sm:$0xff]  ;;  %v690_v10 = vld [vmem:[#allocation8 + $0x10] sm:$0xff] }
  0x49   : > { %v575_v15 = vadd.f32 %v574_v13, %v559_v12  ;;  %643 = vmatpush.msra.mxu0 %v623_v40  ;;  %673 = vmatpush.msra.mxu1 %v659_v56  ;;  %v627_v5 = vld [vmem:[%s1582_s4] sm:$0x1]  ;;  %v689_v11 = vld [vmem:[#allocation8 + $0x8] sm:$0xff]  ;;  %v688_v12 = vld [vmem:[#allocation8] sm:$0xff] }
  0x4a   : > { %708 = vmatpush.msra.mxu2 %v695_v1  ;;  %v691_v9 = vld [vmem:[#allocation8 + $0x18] sm:$0xff] }
  0x4b   : > { %v576_v17 = vadd.f32 %v575_v15, %v560_v14  ;;  %644 = vmatpush.msra.mxu0 %v622_v41  ;;  %674 = vmatpush.msra.mxu1 %v658_v57  ;;  %v728_v13 = vld [vmem:[#allocation10 + $0x38] sm:$0xff]  ;;  %v727_v14 = vld [vmem:[#allocation10 + $0x30] sm:$0xff]  ;;  %v726_v15 = vld [vmem:[#allocation10 + $0x28] sm:$0xff] }
  0x4c   : > { %709 = vmatpush.msra.mxu2 %v694_v2  ;;  %740 = vmatpush.msra.mxu3 %v728_v13  ;;  %v755_v37 = vld [vmem:[%s1589_s11] sm:$0xff] }
  0x4d   : > { %v577_v19 = vadd.f32 %v576_v17, %v561_v16  ;;  %645 = vmatpush.msra.mxu0 %v621_v42  ;;  %675 = vmatpush.msra.mxu1 %v657_v58  ;;  %v725_v16 = vld [vmem:[#allocation10 + $0x20] sm:$0xff]  ;;  %v724_v17 = vld [vmem:[#allocation10 + $0x18] sm:$0xff] }
  0x4e   : > { %710 = vmatpush.msra.mxu2 %v693_v3  ;;  %741 = vmatpush.msra.mxu3 %v727_v14  ;;  %v753_v39 = vld [vmem:[%s1617_s20] sm:$0x1] }
  0x4f   : > { %v578_v21 = vadd.f32 %v577_v19, %v562_v18  ;;  %646 = vmatpush.msra.mxu0 %v620_v43  ;;  %676 = vmatpush.msra.mxu1 %v656_v59  ;;  %v685_v19 = vld [vmem:[%s1584_s6] sm:$0x1] }
  0x50   : > { %711 = vmatpush.msra.mxu2 %v692_v4  ;;  %742 = vmatpush.msra.mxu3 %v726_v15 }
  0x51   : > { %v579_v23 = vadd.f32 %v578_v21, %v563_v20  ;;  %647 = vmatpush.msra.mxu0 %v619_v54  ;;  %677 = vmatpush.msra.mxu1 %v655_v62 }
  0x52   : > { %712 = vmatpush.msra.mxu2 %v691_v9  ;;  %743 = vmatpush.msra.mxu3 %v725_v16 }
  0x53   : > { %v580_v25 = vadd.f32 %v579_v23, %v564_v22  ;;  %678 = vmatpush.msra.mxu1 %v654_v63  ;;  %v723_v23 = vld [vmem:[#allocation10 + $0x10] sm:$0xff] }
  0x54   : > { %713 = vmatpush.msra.mxu2 %v690_v10  ;;  %744 = vmatpush.msra.mxu3 %v724_v17 }
  0x55   : > { %v581_v27 = vadd.f32 %v580_v25, %v565_v24  ;;  %679 = vmatpush.msra.mxu1 %v653_v0  ;;  %v722_v24 = vld [vmem:[#allocation10 + $0x8] sm:$0xff]  ;;  %v721_v25 = vld [vmem:[#allocation10] sm:$0xff] }
  0x56   : > { %714 = vmatpush.msra.mxu2 %v689_v11  ;;  %745 = vmatpush.msra.mxu3 %v723_v23 }
  0x57   : > { %v582_v29 = vadd.f32 %v581_v27, %v566_v26  ;;  %v762_v26 = vld [vmem:[%s1589_s11 + $0x38] sm:$0xff]  ;;  %v761_v27 = vld [vmem:[%s1589_s11 + $0x30] sm:$0xff] }
  0x58   : > { %715 = vmatpush.msra.mxu2 %v688_v12  ;;  %746 = vmatpush.msra.mxu3 %v722_v24 }
  0x59   : > { %v583_v30 = vadd.f32 %v582_v29, %v567_v28  ;;  %774 = vmatpush.msrb.mxu0 %v762_v26  ;;  %v760_v28 = vld [vmem:[%s1589_s11 + $0x28] sm:$0xff]  ;;  %v759_v29 = vld [vmem:[%s1589_s11 + $0x20] sm:$0xff] }
  0x5a   : > { %747 = vmatpush.msra.mxu3 %v721_v25 }
  0x5b   : > { %v590_v31 = vrot.slane %v583_v30, 4  ;;  %775 = vmatpush.msrb.mxu0 %v761_v27 }
  0x5d   : > { %v591_v32 = vadd.f32 %v590_v31, %v583_v30  ;;  %776 = vmatpush.msrb.mxu0 %v760_v28  ;;  %v758_v30 = vld [vmem:[%s1589_s11 + $0x18] sm:$0xff] }
  0x5f   : > { %v592_v33 = vrot.slane %v591_v32, 2  ;;  %777 = vmatpush.msrb.mxu0 %v759_v29 }
  0x61   : > { %v593_v34 = vadd.f32 %v592_v33, %v591_v32  ;;  %778 = vmatpush.msrb.mxu0 %v758_v30 }
  0x63   : > { %v594_v35 = vrot.slane %v593_v34, 1 }
  0x65   : > { %v595_v36 = vadd.f32 %v594_v35, %v593_v34  ;;  %v757_v35 = vld [vmem:[%s1589_s11 + $0x10] sm:$0xff] }
  0x66   : > { %779 = vmatpush.msrb.mxu0 %v757_v35 }
  0x67   : > { %597 = vrot.lane.b32.xlu0 %v595_v36, %s1252_s28  ;;  %605 = vrot.lane.b32.xlu1 %v595_v36, %s1253_s27  ;;  %s1616_s28 = sld [smem:[#allocation20_spill]] }
  0x6d   : > { %v696_v31 = vld [vmem:[%s1616_s28] sm:$0x1] }
  0x6f   : > { %601 = vrot.lane.b32.xlu0 %v595_v36, %s1254_s5  ;;  %s542_s5 = scalar_lea.vmem %s1578_s0, %s1629_s24 }
  0x70   : > { %v611_v51 = vld [vmem:[%s542_s5] sm:$0x1] }
  0xd9   : > { %v598_v44 = vpop.permute.xlu0 %597  ;;  %v606_v47 = vpop.permute.xlu1 %605 }
  0xda   : > { %v600_v45 = vadd.f32 %v598_v44, %v595_v36  ;;  %v756_v36 = vld [vmem:[%s1589_s11 + $0x8] sm:$0xff] }
  0xdb   : > { %780 = vmatpush.msrb.mxu0 %v756_v36 }
  0xdd   : > { %781 = vmatpush.msrb.mxu0 %v755_v37 }
  0xe1   : > { %v602_v46 = vpop.permute.xlu0 %601 }
  0xe2   : > { %v604_v48 = vadd.f32 %v602_v46, %v600_v45 }
  0xe4   : > { %v608_v50 = vadd.f32 %v606_v47, %v604_v48 }
  0xe6   : > { %v610_v52 = vadd.f32 %v609_v49, %v608_v50 }
  0xe8   : > { %v612_v53 = vsub.f32 %v610_v52, %v611_v51 }
  0xea   : > { %614 = vrot.lane.b32.xlu1 %v612_v53, %s1253_s27 }
 0x15c   : > { %v615_v60 = vpop.permute.xlu1 %614 }
 0x15d   : > { %v618_v61 = vsel %vm617_vm0, %v611_v51, %v615_v60 }
 0x15e   : > { %929 = vmatmul.msk.f32.vlgmr.msra.gmra.mxu0 %vm628_vm1, %v618_v61 }
 0x1db   : > { %v649_v6 = vpop.f32.mrf.mxu0 }
 0x1dc   : > { %v650_v7 = vadd.f32 %v649_v6, %v627_v5 }
 0x1de   : > { %v652_v8 = vmax.f32 %v650_v7, 0.0 }
 0x1e0   : > { %930 = vmatmul.msk.f32.vlgmr.msra.gmra.mxu1 %vm628_vm1, %v652_v8 }
 0x25d   : > { %v681_v18 = vpop.f32.mrf.mxu1 }
 0x25e   : > { %v684_v20 = vadd.f32 %v681_v18, %v618_v61 }
 0x260   : > { %v686_v21 = vadd.f32 %v685_v19, %v684_v20 }
 0x262   : > { %v687_v22 = vmax.f32 %v686_v21, 0.0 }
 0x264   : > { %931 = vmatmul.msk.f32.vlgmr.msra.gmra.mxu2 %vm628_vm1, %v687_v22 }
 0x2e7   : > { %v717_v32 = vpop.f32.mrf.mxu2 }
 0x2e8   : > { %v718_v33 = vadd.f32 %v717_v32, %v696_v31 }
 0x2ea   : > { %v720_v34 = vmax.f32 %v718_v33, 0.0 }
 0x2ec   : > { %932 = vmatmul.msk.f32.vlgmr.msra.gmra.mxu3 %vm628_vm1, %v720_v34 }
 0x36f   : > { %v749_v38 = vpop.f32.mrf.mxu3 }
 0x370   : > { %v752_v40 = vadd.f32 %v749_v38, %v687_v22 }
 0x372   : > { %v754_v41 = vadd.f32 %v753_v39, %v752_v40 }
 0x374   : > { %933 = vmatmul.msk.f32.vlgmr.msrb.gmra.mxu0 %vm628_vm1, %v754_v41 }
 0x3f1   : > { %v783_v42 = vpop.f32.mrf.mxu0 }
 0x3f2   : > { %787 = vst.msk [vmem:[%s546_s30] sm:$0x1] %vm786_vm2, %v783_v42 }
 0x3f3 PF: > { %s29_s26 = sadd.s32 1, %s1245_s26   ;;  %s1619_s9 = sld [smem:[#allocation16_spill]] }
 0x3f4   : > { %p26_p2 = scmp.ge.s32.totalorder %s29_s26, 4   ;;  %s1620_s8 = sld [smem:[#allocation15_spill]] }
 0x3f5   : > { %s1621_s21 = smov %s1229_s22  ;;  %s1622_s22 = smov %s1233_s23 }
 0x3f6   : > { %s1624_s24 = smov %s1241_s25  ;;  %28 = sbr.rel (!%p26_p2) target bundleno = 15 (0xf), region = 144 }
 0x3f9   : > { %s1623_s23 = smov %s1619_s9 }
 0x3fa   : > { %s1625_s25 = smov %s1620_s8 }
 0x3fb   :  { %805 = vsyncpa [#allocation4], 1 }
 0x3fc   :  { %807 = vsyncpa [#allocation4 + $0x1], 1 }
 0x3fd   :  { %808 = vsyncpa [#allocation6], 1 }
 0x3fe   :  { %810 = vsyncpa [#allocation6 + $0x1], 1 }
 0x3ff   :  { %811 = vsyncpa [#allocation9], 1 }

// kernel: tpu_custom_call.1
= control target key start
LH: loop header
LB: loop body
LE: loop exit
PB: predicated region body
PF: predicated region fallthrough
CT: control target
= control target key end

     0   :  { %s1586_s0 = inlined_call_operand.vmem [shape: f32[2,1,32], index: 0, kind: input, shape index: {}]   ;;  %s1587_s1 = inlined_call_operand.hbm [shape: f32[2,1,32], index: 1, kind: input, shape index: {}]   ;;  %s1588_s2 = inlined_call_operand.hbm [shape: f32[2,128,128], index: 2, kind: input, shape index: {}]   ;;  %s1589_s3 = inlined_call_operand.vmem [shape: f32[64,64], index: 3, kind: input, shape index: {}]   ;;  %s1590_s4 = inlined_call_operand.vmem [shape: f32[1,64], index: 4, kind: input, shape index: {}]   ;;  %s1591_s5 = inlined_call_operand.hbm [shape: f32[64,64], index: 5, kind: input, shape index: {}]   ;;  %s1592_s6 = inlined_call_operand.vmem [shape: f32[1,64], index: 6, kind: input, shape index: {}]   ;;  %s1593_s7 = inlined_call_operand.hbm [shape: f32[64,64], index: 7, kind: input, shape index: {}]   ;;  %s1594_s8 = inlined_call_operand.vmem [shape: f32[1,64], index: 8, kind: input, shape index: {}]   ;;  %s1595_s9 = inlined_call_operand.hbm [shape: f32[64,64], index: 9, kind: input, shape index: {}]   ;;  %s1596_s10 = inlined_call_operand.vmem [shape: f32[1,64], index: 10, kind: input, shape index: {}]   ;;  %s1597_s11 = inlined_call_operand.vmem [shape: f32[64,1], index: 11, kind: input, shape index: {}]   ;;  %s1598_s12 = inlined_call_operand.vmem [shape: f32[2,1,1], index: 12, kind: output, shape index: {}]  }
   0x1   :  { %1603 = sst [smem:[#allocation17_spill]] %s1587_s1 }
   0x2   :  { %1604 = sst [smem:[#allocation18_spill]] %s1591_s5 }
   0x3   :  { %1605 = sst [smem:[#allocation19_spill]] %s1593_s7 }
   0x4   :  { %1606 = sst [smem:[#allocation20_spill]] %s1594_s8 }
   0x5   :  { %1607 = sst [smem:[#allocation21_spill]] %s1595_s9 }
   0x6   :  { %1608 = sst [smem:[#allocation22_spill]] %s1596_s10 }
   0x7   :  { %1609 = sst [smem:[#allocation23_spill]] %s1598_s12 }
   0x8   :  { %17 = vsyncpa [#allocation4], 0 }
   0x9   :  { %19 = vsyncpa [#allocation4 + $0x1], 0 }
   0xa   :  { %20 = vsyncpa [#allocation6], 0 }
   0xb   :  { %22 = vsyncpa [#allocation6 + $0x1], 0 }
   0xc   :  { %23 = vsyncpa [#allocation9], 0  ;;  %s1328_s21 = smov 0   ;;  %s1330_s22 = smov 0  }
   0xd   :  { %s1332_s23 = smov 0   ;;  %s1334_s24 = smov 0  }
   0xe   :  { %s1336_s25 = smov 0   ;;  %s1338_s26 = smov 0  }
   0xf LB: > { %s1599_s27 = sadd.s32 4294967295, %s1252_s26   ;;  %p922_p0 = scmp.ge.s32.totalorder %s1252_s26, 1  ;;  %s1252_s26 = sphi %s1338_s26, %s29_s26   ;;  %s1248_s25 = sphi %s1336_s25, %s1633_s25   ;;  %s1244_s24 = sphi %s1334_s24, %s1632_s24   ;;  %s1240_s23 = sphi %s1332_s23, %s1631_s23   ;;  %s1236_s22 = sphi %s1330_s22, %s1630_s22   ;;  %s1232_s21 = sphi %s1328_s21, %s1629_s21  }
  0x10   : > { %p1362_p1 = scmp.eq.s32.totalorder %s1599_s27, 0  ;;  %p341_p2 = scmp.lt.s32.totalorder %s1252_s26, 3 }
  0x11   : > { %s1611_s5 = sld [smem:[#allocation18_spill]]  ;;  %s1254_s15 = smov [#allocation7]  }
  0x12   : > { %p1370_p3 = pnand %p922_p0, %p341_p2  ;;  %s360_s16 = sshll.u32 %s1254_s15, 4  ;;  %s361_s16 = int_to_ptr.vmem [resolvable:$true] %s360_s16 }
  0x13   : > { %s1614_s7 = sld [smem:[#allocation19_spill]]  ;;  %s1600_s29 = smov 128  }
  0x14   : > { %p959_p4 = pneg %p1370_p3  ;;  %s1601_s30 = smov 8  }
  0x15   : > { %s1257_s15 = smov [#allocation8]   ;;  %s1615_s9 = sld [smem:[#allocation21_spill]] }
  0x16   : > { %p1378_p5 = pnand %p959_p4, %p1362_p1  ;;  %s377_s27 = sshll.u32 %s1257_s15, 4  ;;  %s378_s27 = int_to_ptr.vmem [resolvable:$true] %s377_s27 }
  0x17   : > { %s358_s13 = sshll.u32 %s1611_s5, 4  ;;  %s74_s15 = sadd.s32 1, %s1240_s23  ;;  %s359_s13 = int_to_ptr.hbm [resolvable:$true] %s358_s13 }
  0x18   : > { %962 = dma.hbm_to_vmem [thread:$0]  (!%p1378_p5), %s359_s13, 1024, %s361_s16, [#allocation6], %s1600_s29, %s1600_s29, %s1601_s30  }
  0x19   : > { %s375_s20 = sshll.u32 %s1614_s7, 4  ;;  %s1258_s7 = smov [#allocation10]   ;;  %s376_s20 = int_to_ptr.hbm [resolvable:$true] %s375_s20 }
  0x1a   : > { %965 = dma.hbm_to_vmem [thread:$0]  (!%p1378_p5), %s376_s20, 1024, %s378_s27, [#allocation9], %s1600_s29, %s1600_s29, %s1601_s30  }
  0x1b   : > { %s392_s5 = sshll.u32 %s1615_s9, 4  ;;  %s394_s13 = sshll.u32 %s1258_s7, 4  ;;  %s393_s5 = int_to_ptr.hbm [resolvable:$true] %s392_s5  ;;  %s395_s13 = int_to_ptr.vmem [resolvable:$true] %s394_s13 }
  0x1c   : > { %968 = dma.hbm_to_vmem [thread:$0]  (!%p1378_p5), %s393_s5, 1024, %s395_s13, [#allocation9], %s1600_s29, %s1600_s29, %s1601_s30  }
  0x1d   : > { %s41_s16 = sadd.s32 1, %s1248_s25  ;;  %p81_p7 = scmp.ne.s32.totalorder %s1240_s23, %s1236_s22 }
  0x1e   : > { %p43_p6 = scmp.ge.s32.totalorder %s41_s16, 2  ;;  %p82_p8 = scmp.eq.s32.totalorder %s1252_s26, 0 }
  0x1f   : > { %p87_p10 = scmp.ne.s32.totalorder %s1236_s22, %s1232_s21  ;;  %p979_p11 = scmp.lt.s32.totalorder %s1252_s26, 2 }
  0x20   : > { %s1635_s16 = smov (%p43_p6, %s41_s16), 0  ;;  %p1410_p9 = por %p82_p8, %p81_p7 }
  0x21   : > { %1616 = sst [smem:[#allocation15_spill]] %s1635_s16  ;;  %s71_s7 = ssub.s32 %s1248_s25, %s1635_s16 }
  0x22   : > { %p72_p12 = scmp.eq.s32.totalorder %s71_s7, 0  ;;  %p1421_p13 = por %p1362_p1, %p87_p10 }
  0x23   : > { %s420_s17 = sand.u32 1, %s1240_s23   ;;  %s1619_s1 = sld [smem:[#allocation17_spill]] }
  0x24   : > { %s1431_s13 = scalar_select %p72_p12, %s1240_s23, %s74_s15  }
  0x25   : > { %s423_s30 = scalar_lea.vmem [#allocation3], %s420_s17  ;;  %p970_p0 = pnand %p979_p11, %p1410_p9 }
  0x26   : > { %1620 = sst [smem:[#allocation16_spill]] %s1431_s13  ;;  %s430_s9 = sshll.u32 %s423_s30, 4  ;;  %s431_s9 = int_to_ptr.vmem [resolvable:$true] %s430_s9 }
  0x27   : > { %s927_s21 = sshll.u32 %s420_s17, 7  ;;  %s942_s7 = sshll.u32 %s1248_s25, 7 }
  0x28   : > { %s441_s16 = scalar_lea.vmem [#allocation5], %s927_s21  ;;  %s421_s10 = scalar_lea.sflag [#allocation4], %s420_s17 }
  0x29   : > { %s426_s19 = scalar_lea.hbm %s1619_s1, %s1248_s25  ;;  %s451_s12 = sshll.u32 %s441_s16, 4  ;;  %s452_s12 = int_to_ptr.vmem [resolvable:$true] %s451_s12 }
  0x2a   : > { %s428_s29 = sshll.u32 %s426_s19, 4  ;;  %s437_s8 = sand.u32 1, %s1252_s26   ;;  %s429_s29 = int_to_ptr.hbm [resolvable:$true] %s428_s29 }
  0x2b   : > { %972 = dma.hbm_to_vmem [thread:$0]  (!%p970_p0), %s429_s29, 16, %s431_s9, %s421_s10  }
  0x2c   : > { %s448_s15 = scalar_lea.hbm %s1588_s2, %s942_s7  ;;  %s438_s19 = scalar_lea.sflag [#allocation6], %s437_s8 }
  0x2d   : > { %s449_s1 = sshll.u32 %s448_s15, 4  ;;  %s1621_s30 = smov 8   ;;  %s450_s1 = int_to_ptr.hbm [resolvable:$true] %s449_s1 }
  0x2e   : > { %s1622_s13 = smov 128   ;;  %463 = sbr.rel (%p1370_p3) target bundleno = 1033 (0x409), region = 68 }
  0x2f   : > { %975 = dma.hbm_to_vmem [thread:$0]  (!%p970_p0), %s450_s1, 2048, %s452_s12, %s438_s19, %s1622_s13, %s1622_s13, %s1621_s30  }
  0x30   : > { %s1446_s16 = sand.u32 (!%p1370_p3), 1, %s1236_s22  }
  0x31   : > { %s466_s9 = scalar_lea.sflag (!%p1370_p3), [#allocation4], %s1446_s16  ;;  %s468_s10 = scalar_lea.vmem (!%p1370_p3), [#allocation3], %s1446_s16 }
  0x33   : > { %1215 = dma.done.wait (%p1421_p13), %s466_s9, 16  }
  0x34   : > { %1217 = vsyncadd (%p1421_p13), %s466_s9, 4294967280  ;;  %s1623_s8 = sadd.s32 4294967295, %s1252_s26   ;;  %s931_s12 = sshll.u32 %s1446_s16, 7 }
  0x35   : > { %s474_s1 = sand.u32 1, %s1623_s8   ;;  %s1457_s29 = scalar_lea.vmem [#allocation5], %s931_s12 }
  0x36   : > { %s475_s14 = scalar_lea.sflag [#allocation6], %s474_s1 }
  0x37   : > { %1219 = dma.done.wait (%p1421_p13), %s475_s14, 2048  }
  0x38   : > { %1221 = vsyncadd (%p1421_p13), %s475_s14, 4294965248 }
  0x39   : > { %1223 = dma.done.wait (%p1362_p1), [#allocation6], 1024  }
  0x3a   : > { %1225 = vsyncadd (%p1362_p1), [#allocation6], 4294966272 }
  0x3b   : > { %1227 = dma.done.wait (%p1362_p1), [#allocation9], 2048  }
  0x3c   : > { %1229 = vsyncadd (%p1362_p1), [#allocation9], 4294965248  ;;  %v1259_v0 = vmov 0.0   ;;  %v552_v1 = vld [vmem:[%s1457_s29] sm:$0xff]  ;;  %v553_v2 = vld [vmem:[%s1457_s29 + $0x8] sm:$0xff]  ;;  %s1260_s28 = smov 96  }
  0x3d   : > { %551 = vst [vmem:[#allocation2] sm:$0xff] %v1259_v0  ;;  %v554_v3 = vld [vmem:[%s1457_s29 + $0x10] sm:$0xff]  ;;  %v569_v4 = vadd.f32 %v553_v2, %v552_v1  ;;  %v555_v5 = vld [vmem:[%s1457_s29 + $0x18] sm:$0xff]  ;;  %v556_v7 = vld [vmem:[%s1457_s29 + $0x20] sm:$0xff]  ;;  %s1261_s27 = smov 32   ;;  %s1262_s5 = smov 64  }
  0x3e   : > { %v557_v9 = vld [vmem:[%s1457_s29 + $0x28] sm:$0xff]  ;;  %v558_v11 = vld [vmem:[%s1457_s29 + $0x30] sm:$0xff]  ;;  %v559_v13 = vld [vmem:[%s1457_s29 + $0x38] sm:$0xff]  ;;  %p540_p1 = scmp.lt.s32.totalorder %s1244_s24, 1  ;;  %vm623_vm0 = vcmask 261120   ;;  %vm634_vm1 = vcmask 523264  }
  0x3f   : > { %v570_v6 = vadd.f32 %v569_v4, %v554_v3  ;;  %v560_v15 = vld [vmem:[%s1457_s29 + $0x40] sm:$0xff]  ;;  %v561_v17 = vld [vmem:[%s1457_s29 + $0x48] sm:$0xff]  ;;  %v562_v19 = vld [vmem:[%s1457_s29 + $0x50] sm:$0xff]  ;;  %s1625_s20 = sld [smem:[#allocation22_spill]]  ;;  %vm792_vm2 = vcmask 0  }
  0x40   : > { %v563_v21 = vld [vmem:[%s1457_s29 + $0x58] sm:$0xff]  ;;  %v564_v23 = vld [vmem:[%s1457_s29 + $0x60] sm:$0xff]  ;;  %v565_v25 = vld [vmem:[%s1457_s29 + $0x68] sm:$0xff]  ;;  %s1637_s24 = smov (!%p540_p1, %s1244_s24), 1  ;;  %s1626_s19 = sld [smem:[#allocation23_spill]] }
  0x41   : > { %v571_v8 = vadd.f32 %v570_v6, %v555_v5  ;;  %v566_v27 = vld [vmem:[%s1457_s29 + $0x70] sm:$0xff]  ;;  %v567_v29 = vld [vmem:[%s1457_s29 + $0x78] sm:$0xff]  ;;  %v631_v48 = vld [vmem:[%s1589_s3 + $0x30] sm:$0xff] }
  0x42   : > { %v632_v47 = vld [vmem:[%s1589_s3 + $0x38] sm:$0xff]  ;;  %v630_v49 = vld [vmem:[%s1589_s3 + $0x28] sm:$0xff]  ;;  %v629_v50 = vld [vmem:[%s1589_s3 + $0x20] sm:$0xff] }
  0x43   : > { %v572_v10 = vadd.f32 %v571_v8, %v556_v7  ;;  %646 = vmatpush.msra.mxu0 %v632_v47  ;;  %v628_v51 = vld [vmem:[%s1589_s3 + $0x18] sm:$0xff]  ;;  %v627_v52 = vld [vmem:[%s1589_s3 + $0x10] sm:$0xff]  ;;  %v626_v53 = vld [vmem:[%s1589_s3 + $0x8] sm:$0xff] }
  0x44   : > { %v568_v37 = vld [vmem:[#allocation2] sm:$0x1]  ;;  %v666_v1 = vld [vmem:[#allocation7 + $0x38] sm:$0xff]  ;;  %v664_v3 = vld [vmem:[#allocation7 + $0x28] sm:$0xff] }
  0x45   : > { %v573_v12 = vadd.f32 %v572_v10, %v557_v9  ;;  %647 = vmatpush.msra.mxu0 %v631_v48  ;;  %v615_v59 = vld [vmem:[%s468_s10] sm:$0x1]  ;;  %678 = vmatpush.msra.mxu1 %v666_v1  ;;  %v663_v4 = vld [vmem:[#allocation7 + $0x20] sm:$0xff]  ;;  %v662_v5 = vld [vmem:[#allocation7 + $0x18] sm:$0xff] }
  0x46   : > { %v625_v0 = vld [vmem:[%s1589_s3] sm:$0xff]  ;;  %v660_v9 = vld [vmem:[#allocation7 + $0x8] sm:$0xff]  ;;  %v659_v10 = vld [vmem:[#allocation7] sm:$0xff]  ;;  %s546_s30 = scalar_lea.vmem %s1626_s19, %s1637_s24 }
  0x47   : > { %v574_v14 = vadd.f32 %v573_v12, %v558_v11  ;;  %648 = vmatpush.msra.mxu0 %v630_v49  ;;  %v665_v2 = vld [vmem:[#allocation7 + $0x30] sm:$0xff]  ;;  %v701_v11 = vld [vmem:[#allocation8 + $0x38] sm:$0xff] }
  0x48   : > { %679 = vmatpush.msra.mxu1 %v665_v2  ;;  %v661_v8 = vld [vmem:[#allocation7 + $0x10] sm:$0xff]  ;;  %714 = vmatpush.msra.mxu2 %v701_v11 }
  0x49   : > { %v575_v16 = vadd.f32 %v574_v14, %v559_v13  ;;  %649 = vmatpush.msra.mxu0 %v629_v50  ;;  %v700_v12 = vld [vmem:[#allocation8 + $0x30] sm:$0xff]  ;;  %v699_v13 = vld [vmem:[#allocation8 + $0x28] sm:$0xff]  ;;  %v698_v14 = vld [vmem:[#allocation8 + $0x20] sm:$0xff] }
  0x4a   : > { %680 = vmatpush.msra.mxu1 %v664_v3  ;;  %715 = vmatpush.msra.mxu2 %v700_v12  ;;  %v761_v47 = vld [vmem:[%s1597_s11] sm:$0xff] }
  0x4b   : > { %v576_v18 = vadd.f32 %v575_v16, %v560_v15  ;;  %650 = vmatpush.msra.mxu0 %v628_v51  ;;  %v633_v15 = vld [vmem:[%s1590_s4] sm:$0x1] }
  0x4c   : > { %681 = vmatpush.msra.mxu1 %v663_v4  ;;  %716 = vmatpush.msra.mxu2 %v699_v13  ;;  %v759_v49 = vld [vmem:[%s1625_s20] sm:$0x1] }
  0x4d   : > { %v577_v20 = vadd.f32 %v576_v18, %v561_v17  ;;  %651 = vmatpush.msra.mxu0 %v627_v52 }
  0x4e   : > { %682 = vmatpush.msra.mxu1 %v662_v5  ;;  %717 = vmatpush.msra.mxu2 %v698_v14 }
  0x4f   : > { %v578_v22 = vadd.f32 %v577_v20, %v562_v19  ;;  %652 = vmatpush.msra.mxu0 %v626_v53  ;;  %v697_v19 = vld [vmem:[#allocation8 + $0x18] sm:$0xff]  ;;  %v696_v20 = vld [vmem:[#allocation8 + $0x10] sm:$0xff] }
  0x50   : > { %683 = vmatpush.msra.mxu1 %v661_v8  ;;  %718 = vmatpush.msra.mxu2 %v697_v19 }
  0x51   : > { %v579_v24 = vadd.f32 %v578_v22, %v563_v21  ;;  %653 = vmatpush.msra.mxu0 %v625_v0  ;;  %v695_v21 = vld [vmem:[#allocation8 + $0x8] sm:$0xff]  ;;  %v694_v22 = vld [vmem:[#allocation8] sm:$0xff] }
  0x52   : > { %684 = vmatpush.msra.mxu1 %v660_v9  ;;  %719 = vmatpush.msra.mxu2 %v696_v20 }
  0x53   : > { %v580_v26 = vadd.f32 %v579_v24, %v564_v23  ;;  %v734_v23 = vld [vmem:[#allocation10 + $0x38] sm:$0xff]  ;;  %v733_v24 = vld [vmem:[#allocation10 + $0x30] sm:$0xff] }
  0x54   : > { %685 = vmatpush.msra.mxu1 %v659_v10  ;;  %720 = vmatpush.msra.mxu2 %v695_v21 }
  0x55   : > { %v581_v28 = vadd.f32 %v580_v26, %v565_v25  ;;  %746 = vmatpush.msra.mxu3 %v734_v23  ;;  %v732_v25 = vld [vmem:[#allocation10 + $0x28] sm:$0xff]  ;;  %v731_v26 = vld [vmem:[#allocation10 + $0x20] sm:$0xff] }
  0x56   : > { %721 = vmatpush.msra.mxu2 %v694_v22 }
  0x57   : > { %v582_v30 = vadd.f32 %v581_v28, %v566_v27  ;;  %747 = vmatpush.msra.mxu3 %v733_v24  ;;  %v730_v27 = vld [vmem:[#allocation10 + $0x18] sm:$0xff] }
  0x59   : > { %v583_v31 = vadd.f32 %v582_v30, %v567_v29  ;;  %748 = vmatpush.msra.mxu3 %v732_v25  ;;  %v691_v29 = vld [vmem:[%s1592_s6] sm:$0x1] }
  0x5b   : > { %v584_v32 = vrot.slane %v583_v31, 4  ;;  %749 = vmatpush.msra.mxu3 %v731_v26 }
  0x5d   : > { %v585_v33 = vadd.f32 %v584_v32, %v583_v31  ;;  %750 = vmatpush.msra.mxu3 %v730_v27 }
  0x5f   : > { %v586_v34 = vrot.slane %v585_v33, 2 }
  0x61   : > { %v587_v35 = vadd.f32 %v586_v34, %v585_v33  ;;  %v729_v33 = vld [vmem:[#allocation10 + $0x10] sm:$0xff]  ;;  %v728_v34 = vld [vmem:[#allocation10 + $0x8] sm:$0xff] }
  0x62   : > { %751 = vmatpush.msra.mxu3 %v729_v33 }
  0x63   : > { %v588_v36 = vrot.slane %v587_v35, 1 }
  0x64   : > { %752 = vmatpush.msra.mxu3 %v728_v34 }
  0x65   : > { %v589_v38 = vadd.f32 %v588_v36, %v587_v35  ;;  %v727_v35 = vld [vmem:[#allocation10] sm:$0xff]  ;;  %v768_v36 = vld [vmem:[%s1597_s11 + $0x38] sm:$0xff] }
  0x66   : > { %753 = vmatpush.msra.mxu3 %v727_v35  ;;  %780 = vmatpush.msrb.mxu0 %v768_v36 }
  0x67   : > { %v590_v39 = vadd.f32 %v589_v38, %v568_v37  ;;  %v767_v37 = vld [vmem:[%s1597_s11 + $0x30] sm:$0xff]  ;;  %v766_v38 = vld [vmem:[%s1597_s11 + $0x28] sm:$0xff] }
  0x68   : > { %781 = vmatpush.msrb.mxu0 %v767_v37 }
  0x69   : > { %591 = vst [vmem:[#allocation2] sm:$0x1] %v590_v39  ;;  %v765_v39 = vld [vmem:[%s1597_s11 + $0x20] sm:$0xff] }
  0x6a   : > { %782 = vmatpush.msrb.mxu0 %v766_v38 }
  0x6c   : > { %783 = vmatpush.msrb.mxu0 %v765_v39 }
  0x70   : > { %v595_v40 = vld [vmem:[#allocation2] sm:$0xff] }
  0x71   : > { %v596_v41 = vrot.slane %v595_v40, 4 }
  0x73   : > { %v597_v42 = vadd.f32 %v596_v41, %v595_v40  ;;  %v764_v40 = vld [vmem:[%s1597_s11 + $0x18] sm:$0xff] }
  0x74   : > { %784 = vmatpush.msrb.mxu0 %v764_v40 }
  0x75   : > { %v598_v43 = vrot.slane %v597_v42, 2 }
  0x77   : > { %v599_v44 = vadd.f32 %v598_v43, %v597_v42 }
  0x79   : > { %v600_v45 = vrot.slane %v599_v44, 1 }
  0x7b   : > { %v601_v46 = vadd.f32 %v600_v45, %v599_v44  ;;  %v763_v45 = vld [vmem:[%s1597_s11 + $0x10] sm:$0xff] }
  0x7c   : > { %785 = vmatpush.msrb.mxu0 %v763_v45 }
  0x7d   : > { %603 = vrot.lane.b32.xlu0 %v601_v46, %s1260_s28  ;;  %611 = vrot.lane.b32.xlu1 %v601_v46, %s1261_s27  ;;  %s1624_s28 = sld [smem:[#allocation20_spill]] }
  0x83   : > { %v702_v41 = vld [vmem:[%s1624_s28] sm:$0x1] }
  0x85   : > { %607 = vrot.lane.b32.xlu0 %v601_v46, %s1262_s5  ;;  %s542_s5 = scalar_lea.vmem %s1586_s0, %s1637_s24 }
  0x86   : > { %v617_v61 = vld [vmem:[%s542_s5] sm:$0x1] }
  0xef   : > { %v604_v54 = vpop.permute.xlu0 %603  ;;  %v612_v57 = vpop.permute.xlu1 %611 }
  0xf0   : > { %v606_v55 = vadd.f32 %v604_v54, %v601_v46  ;;  %v762_v46 = vld [vmem:[%s1597_s11 + $0x8] sm:$0xff] }
  0xf1   : > { %786 = vmatpush.msrb.mxu0 %v762_v46 }
  0xf3   : > { %787 = vmatpush.msrb.mxu0 %v761_v47 }
  0xf7   : > { %v608_v56 = vpop.permute.xlu0 %607 }
  0xf8   : > { %v610_v58 = vadd.f32 %v608_v56, %v606_v55 }
  0xfa   : > { %v614_v60 = vadd.f32 %v612_v57, %v610_v58 }
  0xfc   : > { %v616_v62 = vadd.f32 %v615_v59, %v614_v60 }
  0xfe   : > { %v618_v63 = vsub.f32 %v616_v62, %v617_v61 }
 0x100   : > { %620 = vrot.lane.b32.xlu1 %v618_v63, %s1261_s27 }
 0x172   : > { %v621_v6 = vpop.permute.xlu1 %620 }
 0x173   : > { %v624_v7 = vsel %vm623_vm0, %v617_v61, %v621_v6 }
 0x174   : > { %935 = vmatmul.msk.f32.vlgmr.msra.gmra.mxu0 %vm634_vm1, %v624_v7 }
 0x1f1   : > { %v655_v16 = vpop.f32.mrf.mxu0 }
 0x1f2   : > { %v656_v17 = vadd.f32 %v655_v16, %v633_v15 }
 0x1f4   : > { %v658_v18 = vmax.f32 %v656_v17, 0.0 }
 0x1f6   : > { %936 = vmatmul.msk.f32.vlgmr.msra.gmra.mxu1 %vm634_vm1, %v658_v18 }
 0x273   : > { %v687_v28 = vpop.f32.mrf.mxu1 }
 0x274   : > { %v690_v30 = vadd.f32 %v687_v28, %v624_v7 }
 0x276   : > { %v692_v31 = vadd.f32 %v691_v29, %v690_v30 }
 0x278   : > { %v693_v32 = vmax.f32 %v692_v31, 0.0 }
 0x27a   : > { %937 = vmatmul.msk.f32.vlgmr.msra.gmra.mxu2 %vm634_vm1, %v693_v32 }
 0x2fd   : > { %v723_v42 = vpop.f32.mrf.mxu2 }
 0x2fe   : > { %v724_v43 = vadd.f32 %v723_v42, %v702_v41 }
 0x300   : > { %v726_v44 = vmax.f32 %v724_v43, 0.0 }
 0x302   : > { %938 = vmatmul.msk.f32.vlgmr.msra.gmra.mxu3 %vm634_vm1, %v726_v44 }
 0x385   : > { %v755_v48 = vpop.f32.mrf.mxu3 }
 0x386   : > { %v758_v50 = vadd.f32 %v755_v48, %v693_v32 }
 0x388   : > { %v760_v51 = vadd.f32 %v759_v49, %v758_v50 }
 0x38a   : > { %939 = vmatmul.msk.f32.vlgmr.msrb.gmra.mxu0 %vm634_vm1, %v760_v51 }
 0x407   : > { %v789_v52 = vpop.f32.mrf.mxu0 }
 0x408   : > { %793 = vst.msk [vmem:[%s546_s30] sm:$0x1] %vm792_vm2, %v789_v52 }
 0x409 PF: > { %s29_s26 = sadd.s32 1, %s1252_s26   ;;  %s1627_s9 = sld [smem:[#allocation16_spill]] }
 0x40a   : > { %p26_p2 = scmp.ge.s32.totalorder %s29_s26, 4   ;;  %s1628_s8 = sld [smem:[#allocation15_spill]] }
 0x40b   : > { %s1629_s21 = smov %s1236_s22  ;;  %s1630_s22 = smov %s1240_s23 }
 0x40c   : > { %s1632_s24 = smov %s1248_s25  ;;  %28 = sbr.rel (!%p26_p2) target bundleno = 15 (0xf), region = 144 }
 0x40f   : > { %s1631_s23 = smov %s1627_s9 }
 0x410   : > { %s1633_s25 = smov %s1628_s8 }
 0x411   :  { %811 = vsyncpa [#allocation4], 1 }
 0x412   :  { %813 = vsyncpa [#allocation4 + $0x1], 1 }
 0x413   :  { %814 = vsyncpa [#allocation6], 1 }
 0x414   :  { %816 = vsyncpa [#allocation6 + $0x1], 1 }
 0x415   :  { %817 = vsyncpa [#allocation9], 1 }

</bundles_post_ra>
